<compile_context>
chip_gen: v7x
topology: tpu7x:2x2x1
jax: 0.10.0
libtpu: 0.0.40
codegen_flags: <defaults>
</compile_context>

<pallas_src>
import jax
import jax.numpy as jnp
from jax import lax
from jax.experimental import pallas as pl
from jax.experimental.pallas import tpu as pltpu

# ----------------- synthetic config -----------------
HIDDEN = 32          # size_petrained (synthetic mini-BERT hidden size)
FFN = 64             # BERT intermediate size
VOCAB = 64
MAX_POS = 16
LSTM_HIDDEN = 32
DENSE_HIDDEN = 16
NUM_LABELS = 3
LN_EPS = 1e-12


# =====================================================================
# Single fused kernel: mini-BERT encoder + pooler (all segments batched)
#                      -> LSTM over segments -> last-step select -> FC head
# =====================================================================
def robert_fused_kernel(emb_ref, bias_ref, sel_ref,
                        qkv_w_ref, qkv_b_ref, wo_ref, wo_b_ref, ln_ref,
                        ff1_w_ref, ff1_b_ref, ff2_w_ref, ff2_b_ref,
                        pool_w_ref, pool_b_ref,
                        wih_ref, whh_ref, lstm_b_ref,
                        fc1_w_ref, fc1_b_ref, fc2_w_ref, fc2_b_ref,
                        out_ref):
    TL, H = emb_ref.shape            # (T*L, H) summed embeddings, time-major segments
    B, S = sel_ref.shape             # one-hot last-step selector per sentence
    T = B * S
    L = TL // T
    LH = whh_ref.shape[0]            # lstm hidden
    f32 = jnp.float32
    bf16 = jnp.bfloat16

    ln = ln_ref[...]                 # (3, 2, H): [emb, post-attn, post-ffn] x [gamma, beta]

    def layer_norm(h, idx):
        g = ln[idx, 0:1, :]
        b = ln[idx, 1:2, :]
        mu = jnp.mean(h, axis=-1, keepdims=True)
        var = jnp.mean((h - mu) ** 2, axis=-1, keepdims=True)
        return (h - mu) * lax.rsqrt(var + LN_EPS) * g + b

    # ---- embedding LayerNorm (dropout_plm = identity at inference) ----
    x = layer_norm(emb_ref[...], 0)                                   # (T*L, H) f32

    # ---- fused Q/K/V projection: one 96-lane matmul ----
    qkv = jnp.dot(x.astype(bf16), qkv_w_ref[...],
                  preferred_element_type=f32) + qkv_b_ref[...]        # (T*L, 3H)
    q = qkv[:, 0:H].reshape(T, L, H)
    k = qkv[:, H:2 * H].reshape(T, L, H)
    v = qkv[:, 2 * H:3 * H].reshape(T, L, H)

    # ---- single-head self-attention, batched over segments ----
    scores = jnp.einsum('tld,tmd->tlm', q.astype(bf16), k.astype(bf16),
                        preferred_element_type=f32) * (H ** -0.5)     # (T, L, L)
    scores = scores + bias_ref[...]                                   # + (T, 1, L) mask bias
    scores = scores - jnp.max(scores, axis=-1, keepdims=True)
    p = jnp.exp(scores)
    p = p * pl.reciprocal(jnp.sum(p, axis=-1, keepdims=True), approx=True)
    ctx = jnp.einsum('tlm,tmd->tld', p.astype(bf16), v.astype(bf16),
                     preferred_element_type=f32)                      # (T, L, H)
    attn_out = jnp.dot(ctx.reshape(TL, H).astype(bf16), wo_ref[...],
                       preferred_element_type=f32) + wo_b_ref[...]
    h1 = layer_norm(x + attn_out, 1)                                  # (T*L, H)

    # ---- from here only the [CLS] row of each segment is needed ----
    h1_cls = h1.reshape(T, L, H)[:, 0, :]                             # (T, H)
    ff = jnp.dot(h1_cls.astype(bf16), ff1_w_ref[...],
                 preferred_element_type=f32) + ff1_b_ref[...]
    ff = jax.nn.gelu(ff, approximate=True)
    ff = jnp.dot(ff.astype(bf16), ff2_w_ref[...],
                 preferred_element_type=f32) + ff2_b_ref[...]
    h2 = layer_norm(h1_cls + ff, 2)
    pooled = jnp.tanh(jnp.dot(h2.astype(bf16), pool_w_ref[...],
                              preferred_element_type=f32) + pool_b_ref[...])   # (T, H)

    # ---- LSTM over segments (time-major rows: time s occupies rows [s*B, (s+1)*B)) ----
    wih = wih_ref[...]
    whh = whh_ref[...]
    lb = lstm_b_ref[...]
    sel = sel_ref[...]                                                # (B, S) one-hot f32
    h = jnp.zeros((B, LH), f32)
    c = jnp.zeros((B, LH), f32)
    last = jnp.zeros((B, LH), f32)
    for s in range(S):                                                # static unroll (S small)
        x_t = pooled[s * B:(s + 1) * B, :]                            # (B, H)
        gates = (jnp.dot(x_t.astype(bf16), wih, preferred_element_type=f32)
                 + jnp.dot(h.astype(bf16), whh, preferred_element_type=f32) + lb)
        i_g = jax.nn.sigmoid(gates[:, 0 * LH:1 * LH])
        f_g = jax.nn.sigmoid(gates[:, 1 * LH:2 * LH])
        g_g = jnp.tanh(gates[:, 2 * LH:3 * LH])
        o_g = jax.nn.sigmoid(gates[:, 3 * LH:4 * LH])
        c = f_g * c + i_g * g_g
        h = o_g * jnp.tanh(c)
        # one-hot select of the last valid time step (dropout_lstm = identity)
        last = last + sel[:, s:s + 1] * h

    # ---- FC head: Linear -> Linear (no nonlinearity in the PyTorch Sequential) ----
    hfc = jnp.dot(last.astype(bf16), fc1_w_ref[...],
                  preferred_element_type=f32) + fc1_b_ref[...]
    out_ref[...] = jnp.dot(hfc.astype(bf16), fc2_w_ref[...],
                           preferred_element_type=f32) + fc2_b_ref[...]


# =====================================================================
# Full forward (glue in plain JAX: embedding gather, transpose, one-hot)
# =====================================================================
def robert_forward(params, input_ids, attention_mask, token_type_ids, num_segments):
    B, S, L = input_ids.shape
    T = B * S
    f32 = jnp.float32
    bf16 = jnp.bfloat16

    # Time-major segment ordering (row index = s*B + b) so the LSTM time slices
    # are contiguous static slices inside the kernel.
    ids = jnp.transpose(input_ids, (1, 0, 2)).reshape(T, L)
    tt = jnp.transpose(token_type_ids, (1, 0, 2)).reshape(T, L)
    am = jnp.transpose(attention_mask, (1, 0, 2)).reshape(T, L).astype(f32)

    # Embedding gather stays in JAX glue (not the matmul hot path).
    emb = (params['word_emb'][ids]
           + params['pos_emb'][jnp.arange(L)][None, :, :]
           + params['type_emb'][tt]).astype(f32)
    emb2 = emb.reshape(T * L, HIDDEN)
    mask_bias = ((1.0 - am) * -1e9).reshape(T, 1, L)

    # One-hot selector of the last valid LSTM step per sentence.
    # NOTE: if num_segments > S the selected row is all-zero (document the assumption).
    sel = (jnp.arange(S)[None, :] == (num_segments.astype(jnp.int32) - 1)[:, None]).astype(f32)

    # Fuse QKV weights into one (H, 3H) matmul operand; cast MXU operands to bf16.
    qkv_w = jnp.concatenate([params['attn_w'][0], params['attn_w'][1],
                             params['attn_w'][2]], axis=1).astype(bf16)          # (H, 3H)
    qkv_b = jnp.concatenate([params['attn_b'][0], params['attn_b'][1],
                             params['attn_b'][2]], axis=0).reshape(1, 3 * HIDDEN)
    wo_w = params['attn_w'][3].astype(bf16)
    wo_b = params['attn_b'][3].reshape(1, HIDDEN)

    vmem = lambda: pl.BlockSpec(memory_space=pltpu.MemorySpace.VMEM)
    n_in = 21
    logits = pl.pallas_call(
        robert_fused_kernel,
        out_shape=jax.ShapeDtypeStruct((B, NUM_LABELS), f32),
        in_specs=[vmem() for _ in range(n_in)],
        out_specs=vmem(),
    )(emb2, mask_bias, sel,
      qkv_w, qkv_b, wo_w, wo_b, params['ln'],
      params['ff1_w'].astype(bf16), params['ff1_b'],
      params['ff2_w'].astype(bf16), params['ff2_b'],
      params['pool_w'].astype(bf16), params['pool_b'],
      params['lstm_wih'].astype(bf16), params['lstm_whh'].astype(bf16), params['lstm_b'],
      params['fc1_w'].astype(bf16), params['fc1_b'],
      params['fc2_w'].astype(bf16), params['fc2_b'])
    return logits


# =====================================================================
# Deterministic synthetic parameters
# =====================================================================
def init_params(key):
    ks = jax.random.split(key, 16)
    std = 0.02  # BERT initializer_range

    def n(k, shape):
        return jax.random.normal(k, shape, jnp.float32) * std

    bound = 1.0 / (LSTM_HIDDEN ** 0.5)

    def u(k, shape):
        return jax.random.uniform(k, shape, jnp.float32, -bound, bound)

    ln_one = jnp.stack([jnp.ones((HIDDEN,), jnp.float32),
                        jnp.zeros((HIDDEN,), jnp.float32)])       # (2, H)
    p = {
        'word_emb': n(ks[0], (VOCAB, HIDDEN)),
        'pos_emb':  n(ks[1], (MAX_POS, HIDDEN)),
        'type_emb': n(ks[2], (2, HIDDEN)),
        'attn_w':   n(ks[3], (4, HIDDEN, HIDDEN)),                # Wq, Wk, Wv, Wo (in, out)
        'attn_b':   jnp.zeros((4, HIDDEN), jnp.float32),
        'ln':       jnp.stack([ln_one, ln_one, ln_one]),          # (3, 2, H)
        'ff1_w':    n(ks[4], (HIDDEN, FFN)),
        'ff1_b':    jnp.zeros((1, FFN), jnp.float32),
        'ff2_w':    n(ks[5], (FFN, HIDDEN)),
        'ff2_b':    jnp.zeros((1, HIDDEN), jnp.float32),
        'pool_w':   n(ks[6], (HIDDEN, HIDDEN)),
        'pool_b':   jnp.zeros((1, HIDDEN), jnp.float32),
        # LSTM weights stored as (in, 4*hid), gate order i, f, g, o
        'lstm_wih': u(ks[7], (HIDDEN, 4 * LSTM_HIDDEN)),
        'lstm_whh': u(ks[8], (LSTM_HIDDEN, 4 * LSTM_HIDDEN)),
        'lstm_b':   u(ks[9], (1, 4 * LSTM_HIDDEN)) + u(ks[10], (1, 4 * LSTM_HIDDEN)),
        'fc1_w':    n(ks[11], (LSTM_HIDDEN, DENSE_HIDDEN)),
        'fc1_b':    jnp.zeros((1, DENSE_HIDDEN), jnp.float32),
        'fc2_w':    n(ks[12], (DENSE_HIDDEN, NUM_LABELS)),
        'fc2_b':    jnp.zeros((1, NUM_LABELS), jnp.float32),
    }
    return p


# =====================================================================
# Pure-jnp f32 reference (numerical sanity check)
# =====================================================================
def reference_forward(params, input_ids, attention_mask, token_type_ids, num_segments):
    B, S, L = input_ids.shape
    T = B * S
    ids = input_ids.reshape(T, L)
    tt = token_type_ids.reshape(T, L)
    am = attention_mask.reshape(T, L).astype(jnp.float32)

    def ln(x, g, b):
        mu = x.mean(-1, keepdims=True)
        var = ((x - mu) ** 2).mean(-1, keepdims=True)
        return (x - mu) / jnp.sqrt(var + LN_EPS) * g + b

    x = params['word_emb'][ids] + params['pos_emb'][jnp.arange(L)][None] + params['type_emb'][tt]
    x = ln(x, params['ln'][0, 0], params['ln'][0, 1])
    q = x @ params['attn_w'][0] + params['attn_b'][0]
    k = x @ params['attn_w'][1] + params['attn_b'][1]
    v = x @ params['attn_w'][2] + params['attn_b'][2]
    sc = jnp.einsum('tld,tmd->tlm', q, k) * (HIDDEN ** -0.5)
    sc = sc + ((1.0 - am) * -1e9)[:, None, :]
    p = jax.nn.softmax(sc, axis=-1)
    ctx = jnp.einsum('tlm,tmd->tld', p, v)
    ao = ctx @ params['attn_w'][3] + params['attn_b'][3]
    h1 = ln(x + ao, params['ln'][1, 0], params['ln'][1, 1])
    ff = jax.nn.gelu(h1 @ params['ff1_w'] + params['ff1_b'], approximate=True)
    ff = ff @ params['ff2_w'] + params['ff2_b']
    h2 = ln(h1 + ff, params['ln'][2, 0], params['ln'][2, 1])
    pooled = jnp.tanh(h2[:, 0, :] @ params['pool_w'] + params['pool_b'])

    doc = pooled.reshape(B, S, HIDDEN)
    hid = LSTM_HIDDEN
    h = jnp.zeros((B, hid), jnp.float32)
    c = jnp.zeros((B, hid), jnp.float32)
    outs = []
    for t in range(S):
        gates = doc[:, t, :] @ params['lstm_wih'] + h @ params['lstm_whh'] + params['lstm_b']
        i = jax.nn.sigmoid(gates[:, :hid])
        f = jax.nn.sigmoid(gates[:, hid:2 * hid])
        g = jnp.tanh(gates[:, 2 * hid:3 * hid])
        o = jax.nn.sigmoid(gates[:, 3 * hid:4 * hid])
        c = f * c + i * g
        h = o * jnp.tanh(c)
        outs.append(h)
    lstm_out = jnp.stack(outs, axis=1)
    last = lstm_out[jnp.arange(B), num_segments - 1]
    logits = (last @ params['fc1_w'] + params['fc1_b']) @ params['fc2_w'] + params['fc2_b']
    return logits


if __name__ == "__main__":
    key = jax.random.PRNGKey(0)
    pkey, dkey = jax.random.split(key)
    params = init_params(pkey)

    # x = {'input_ids', 'attention_mask', 'token_type_ids', 'num_segments'}
    B, S, L = 2, 4, 8     # num_sentences, max_segments, segment_length
    k1, k2 = jax.random.split(dkey)
    input_ids = jax.random.randint(k1, (B, S, L), 0, VOCAB, dtype=jnp.int32)
    lens = jax.random.randint(k2, (B, S), 3, L + 1)
    attention_mask = (jnp.arange(L)[None, None, :] < lens[:, :, None]).astype(jnp.int32)
    token_type_ids = jnp.zeros((B, S, L), jnp.int32)
    num_segments = jnp.array([3, 4], dtype=jnp.int32)

    fwd = jax.jit(robert_forward)
    logits = fwd(params, input_ids, attention_mask, token_type_ids, num_segments)
    logits = jax.block_until_ready(logits)

    ref = reference_forward(params, input_ids, attention_mask, token_type_ids, num_segments)
    assert logits.shape == (B, NUM_LABELS)
    assert bool(jnp.all(jnp.isfinite(logits)))
    assert float(jnp.max(jnp.abs(logits - ref))) < 1e-2, "kernel/reference mismatch"
    print("KERNEL_OK")
</pallas_src>

<mosaic_0001>
module attributes {stable_mosaic.version = 11 : i64} {
  func.func @robert_fused_kernel(%arg0: memref<64x32xf32, #tpu.memory_space<vmem>>, %arg1: memref<8x1x8xf32, #tpu.memory_space<vmem>>, %arg2: memref<2x4xf32, #tpu.memory_space<vmem>>, %arg3: memref<32x96xbf16, #tpu.memory_space<vmem>>, %arg4: memref<1x96xf32, #tpu.memory_space<vmem>>, %arg5: memref<32x32xbf16, #tpu.memory_space<vmem>>, %arg6: memref<1x32xf32, #tpu.memory_space<vmem>>, %arg7: memref<3x2x32xf32, #tpu.memory_space<vmem>>, %arg8: memref<32x64xbf16, #tpu.memory_space<vmem>>, %arg9: memref<1x64xf32, #tpu.memory_space<vmem>>, %arg10: memref<64x32xbf16, #tpu.memory_space<vmem>>, %arg11: memref<1x32xf32, #tpu.memory_space<vmem>>, %arg12: memref<32x32xbf16, #tpu.memory_space<vmem>>, %arg13: memref<1x32xf32, #tpu.memory_space<vmem>>, %arg14: memref<32x128xbf16, #tpu.memory_space<vmem>>, %arg15: memref<32x128xbf16, #tpu.memory_space<vmem>>, %arg16: memref<1x128xf32, #tpu.memory_space<vmem>>, %arg17: memref<32x16xbf16, #tpu.memory_space<vmem>>, %arg18: memref<1x16xf32, #tpu.memory_space<vmem>>, %arg19: memref<16x3xbf16, #tpu.memory_space<vmem>>, %arg20: memref<1x3xf32, #tpu.memory_space<vmem>>, %arg21: memref<2x3xf32, #tpu.memory_space<vmem>>) attributes {dimension_semantics = [], scalar_prefetch = 0 : i64, scratch_operands = 0 : i64, tpu.core_type = #tpu.core_type<tc>} {
    %c0 = arith.constant 0 : index
    %c0_0 = arith.constant 0 : index
    %c0_1 = arith.constant 0 : index
    %0 = vector.load %arg7[%c0, %c0_0, %c0_1] : memref<3x2x32xf32, #tpu.memory_space<vmem>>, vector<3x2x32xf32>
    %c0_2 = arith.constant 0 : index
    %c0_3 = arith.constant 0 : index
    %1 = vector.load %arg0[%c0_2, %c0_3] : memref<64x32xf32, #tpu.memory_space<vmem>>, vector<64x32xf32>
    %2 = vector.extract_strided_slice %0 {offsets = [0, 0, 0], sizes = [1, 1, 32], strides = [1, 1, 1]} : vector<3x2x32xf32> to vector<1x1x32xf32>
    %3 = vector.shape_cast %2 : vector<1x1x32xf32> to vector<1x32xf32>
    %4 = vector.extract_strided_slice %0 {offsets = [0, 1, 0], sizes = [1, 1, 32], strides = [1, 1, 1]} : vector<3x2x32xf32> to vector<1x1x32xf32>
    %5 = vector.shape_cast %4 : vector<1x1x32xf32> to vector<1x32xf32>
    %cst = arith.constant dense<0.000000e+00> : vector<64xf32>
    %6 = vector.multi_reduction <add>, %1, %cst [1] : vector<64x32xf32> to vector<64xf32>
    %7 = vector.shape_cast %6 : vector<64xf32> to vector<64x1xf32>
    %cst_4 = arith.constant 3.200000e+01 : f32
    %8 = vector.broadcast %cst_4 : f32 to vector<64x1xf32>
    %9 = arith.divf %7, %8 : vector<64x1xf32>
    %10 = vector.broadcast %9 : vector<64x1xf32> to vector<64x32xf32>
    %11 = arith.subf %1, %10 : vector<64x32xf32>
    %12 = arith.mulf %11, %11 : vector<64x32xf32>
    %cst_5 = arith.constant dense<0.000000e+00> : vector<64xf32>
    %13 = vector.multi_reduction <add>, %12, %cst_5 [1] : vector<64x32xf32> to vector<64xf32>
    %14 = vector.shape_cast %13 : vector<64xf32> to vector<64x1xf32>
    %cst_6 = arith.constant 3.200000e+01 : f32
    %15 = vector.broadcast %cst_6 : f32 to vector<64x1xf32>
    %16 = arith.divf %14, %15 : vector<64x1xf32>
    %17 = vector.broadcast %9 : vector<64x1xf32> to vector<64x32xf32>
    %18 = arith.subf %1, %17 : vector<64x32xf32>
    %cst_7 = arith.constant 9.99999996E-13 : f32
    %19 = vector.broadcast %cst_7 : f32 to vector<64x1xf32>
    %20 = arith.addf %16, %19 : vector<64x1xf32>
    %21 = math.rsqrt %20 : vector<64x1xf32>
    %22 = vector.broadcast %21 : vector<64x1xf32> to vector<64x32xf32>
    %23 = arith.mulf %18, %22 : vector<64x32xf32>
    %24 = vector.broadcast %3 : vector<1x32xf32> to vector<64x32xf32>
    %25 = arith.mulf %23, %24 : vector<64x32xf32>
    %26 = vector.broadcast %5 : vector<1x32xf32> to vector<64x32xf32>
    %27 = arith.addf %25, %26 : vector<64x32xf32>
    %28 = arith.truncf %27 : vector<64x32xf32> to vector<64x32xbf16>
    %c0_8 = arith.constant 0 : index
    %c0_9 = arith.constant 0 : index
    %29 = vector.load %arg3[%c0_8, %c0_9] : memref<32x96xbf16, #tpu.memory_space<vmem>>, vector<32x96xbf16>
    %cst_10 = arith.constant dense<0.000000e+00> : vector<64x96xf32>
    %30 = tpu.matmul %28, %29, %cst_10 {dimension_numbers = #tpu.dot_dimension_numbers<[1], [0], [0], [1], [0, 0, 1, 1], [], []>} : vector<64x32xbf16>, vector<32x96xbf16>, vector<64x96xf32> -> vector<64x96xf32>
    %c0_11 = arith.constant 0 : index
    %c0_12 = arith.constant 0 : index
    %31 = vector.load %arg4[%c0_11, %c0_12] : memref<1x96xf32, #tpu.memory_space<vmem>>, vector<1x96xf32>
    %32 = vector.broadcast %31 : vector<1x96xf32> to vector<64x96xf32>
    %33 = arith.addf %30, %32 : vector<64x96xf32>
    %34 = vector.extract_strided_slice %33 {offsets = [0, 0], sizes = [64, 32], strides = [1, 1]} : vector<64x96xf32> to vector<64x32xf32>
    %35 = vector.shape_cast %34 : vector<64x32xf32> to vector<8x8x32xf32>
    %36 = vector.extract_strided_slice %33 {offsets = [0, 32], sizes = [64, 32], strides = [1, 1]} : vector<64x96xf32> to vector<64x32xf32>
    %37 = vector.shape_cast %36 : vector<64x32xf32> to vector<8x8x32xf32>
    %38 = vector.extract_strided_slice %33 {offsets = [0, 64], sizes = [64, 32], strides = [1, 1]} : vector<64x96xf32> to vector<64x32xf32>
    %39 = vector.shape_cast %38 : vector<64x32xf32> to vector<8x8x32xf32>
    %40 = arith.truncf %35 : vector<8x8x32xf32> to vector<8x8x32xbf16>
    %41 = arith.truncf %37 : vector<8x8x32xf32> to vector<8x8x32xbf16>
    "tpu.trace_start"() <{level = 10 : i32, message = "tld,tmd->tlm"}> : () -> ()
    %cst_13 = arith.constant dense<0.000000e+00> : vector<8x8x8xf32>
    %42 = tpu.matmul %40, %41, %cst_13 {dimension_numbers = #tpu.dot_dimension_numbers<[2], [2], [1], [1], [0, 0, 0, 1, 1, 1], [0], [0]>} : vector<8x8x32xbf16>, vector<8x8x32xbf16>, vector<8x8x8xf32> -> vector<8x8x8xf32>
    "tpu.trace_stop"() : () -> ()
    %cst_14 = arith.constant 0.176776692 : f32
    %43 = vector.broadcast %cst_14 : f32 to vector<8x8x8xf32>
    %44 = arith.mulf %42, %43 : vector<8x8x8xf32>
    %c0_15 = arith.constant 0 : index
    %c0_16 = arith.constant 0 : index
    %c0_17 = arith.constant 0 : index
    %45 = vector.load %arg1[%c0_15, %c0_16, %c0_17] : memref<8x1x8xf32, #tpu.memory_space<vmem>>, vector<8x1x8xf32>
    %46 = vector.broadcast %45 : vector<8x1x8xf32> to vector<8x8x8xf32>
    %47 = arith.addf %44, %46 : vector<8x8x8xf32>
    %cst_18 = arith.constant dense<0xFF800000> : vector<8x8xf32>
    %48 = vector.multi_reduction <maximumf>, %47, %cst_18 [2] : vector<8x8x8xf32> to vector<8x8xf32>
    %49 = vector.shape_cast %48 : vector<8x8xf32> to vector<8x8x1xf32>
    %50 = vector.broadcast %49 : vector<8x8x1xf32> to vector<8x8x8xf32>
    %51 = arith.subf %47, %50 : vector<8x8x8xf32>
    %52 = math.exp %51 : vector<8x8x8xf32>
    %cst_19 = arith.constant dense<0.000000e+00> : vector<8x8xf32>
    %53 = vector.multi_reduction <add>, %52, %cst_19 [2] : vector<8x8x8xf32> to vector<8x8xf32>
    %54 = vector.shape_cast %53 : vector<8x8xf32> to vector<8x8x1xf32>
    %55 = tpu.reciprocal %54 {approx = true} : vector<8x8x1xf32> -> vector<8x8x1xf32>
    %56 = vector.broadcast %55 : vector<8x8x1xf32> to vector<8x8x8xf32>
    %57 = arith.mulf %52, %56 : vector<8x8x8xf32>
    %58 = arith.truncf %57 : vector<8x8x8xf32> to vector<8x8x8xbf16>
    %59 = arith.truncf %39 : vector<8x8x32xf32> to vector<8x8x32xbf16>
    "tpu.trace_start"() <{level = 10 : i32, message = "tlm,tmd->tld"}> : () -> ()
    %cst_20 = arith.constant dense<0.000000e+00> : vector<8x8x32xf32>
    %60 = tpu.matmul %58, %59, %cst_20 {dimension_numbers = #tpu.dot_dimension_numbers<[2], [1], [1], [2], [0, 0, 0, 1, 1, 2], [0], [0]>} : vector<8x8x8xbf16>, vector<8x8x32xbf16>, vector<8x8x32xf32> -> vector<8x8x32xf32>
    "tpu.trace_stop"() : () -> ()
    %61 = vector.shape_cast %60 : vector<8x8x32xf32> to vector<64x32xf32>
    %62 = arith.truncf %61 : vector<64x32xf32> to vector<64x32xbf16>
    %c0_21 = arith.constant 0 : index
    %c0_22 = arith.constant 0 : index
    %63 = vector.load %arg5[%c0_21, %c0_22] : memref<32x32xbf16, #tpu.memory_space<vmem>>, vector<32x32xbf16>
    %cst_23 = arith.constant dense<0.000000e+00> : vector<64x32xf32>
    %64 = tpu.matmul %62, %63, %cst_23 {dimension_numbers = #tpu.dot_dimension_numbers<[1], [0], [0], [1], [0, 0, 1, 1], [], []>} : vector<64x32xbf16>, vector<32x32xbf16>, vector<64x32xf32> -> vector<64x32xf32>
    %c0_24 = arith.constant 0 : index
    %c0_25 = arith.constant 0 : index
    %65 = vector.load %arg6[%c0_24, %c0_25] : memref<1x32xf32, #tpu.memory_space<vmem>>, vector<1x32xf32>
    %66 = vector.broadcast %65 : vector<1x32xf32> to vector<64x32xf32>
    %67 = arith.addf %64, %66 : vector<64x32xf32>
    %68 = arith.addf %27, %67 : vector<64x32xf32>
    %69 = vector.extract_strided_slice %0 {offsets = [1, 0, 0], sizes = [1, 1, 32], strides = [1, 1, 1]} : vector<3x2x32xf32> to vector<1x1x32xf32>
    %70 = vector.shape_cast %69 : vector<1x1x32xf32> to vector<1x32xf32>
    %71 = vector.extract_strided_slice %0 {offsets = [1, 1, 0], sizes = [1, 1, 32], strides = [1, 1, 1]} : vector<3x2x32xf32> to vector<1x1x32xf32>
    %72 = vector.shape_cast %71 : vector<1x1x32xf32> to vector<1x32xf32>
    %cst_26 = arith.constant dense<0.000000e+00> : vector<64xf32>
    %73 = vector.multi_reduction <add>, %68, %cst_26 [1] : vector<64x32xf32> to vector<64xf32>
    %74 = vector.shape_cast %73 : vector<64xf32> to vector<64x1xf32>
    %cst_27 = arith.constant 3.200000e+01 : f32
    %75 = vector.broadcast %cst_27 : f32 to vector<64x1xf32>
    %76 = arith.divf %74, %75 : vector<64x1xf32>
    %77 = vector.broadcast %76 : vector<64x1xf32> to vector<64x32xf32>
    %78 = arith.subf %68, %77 : vector<64x32xf32>
    %79 = arith.mulf %78, %78 : vector<64x32xf32>
    %cst_28 = arith.constant dense<0.000000e+00> : vector<64xf32>
    %80 = vector.multi_reduction <add>, %79, %cst_28 [1] : vector<64x32xf32> to vector<64xf32>
    %81 = vector.shape_cast %80 : vector<64xf32> to vector<64x1xf32>
    %cst_29 = arith.constant 3.200000e+01 : f32
    %82 = vector.broadcast %cst_29 : f32 to vector<64x1xf32>
    %83 = arith.divf %81, %82 : vector<64x1xf32>
    %84 = vector.broadcast %76 : vector<64x1xf32> to vector<64x32xf32>
    %85 = arith.subf %68, %84 : vector<64x32xf32>
    %cst_30 = arith.constant 9.99999996E-13 : f32
    %86 = vector.broadcast %cst_30 : f32 to vector<64x1xf32>
    %87 = arith.addf %83, %86 : vector<64x1xf32>
    %88 = math.rsqrt %87 : vector<64x1xf32>
    %89 = vector.broadcast %88 : vector<64x1xf32> to vector<64x32xf32>
    %90 = arith.mulf %85, %89 : vector<64x32xf32>
    %91 = vector.broadcast %70 : vector<1x32xf32> to vector<64x32xf32>
    %92 = arith.mulf %90, %91 : vector<64x32xf32>
    %93 = vector.broadcast %72 : vector<1x32xf32> to vector<64x32xf32>
    %94 = arith.addf %92, %93 : vector<64x32xf32>
    %95 = vector.shape_cast %94 : vector<64x32xf32> to vector<8x8x32xf32>
    %96 = vector.extract_strided_slice %95 {offsets = [0, 0, 0], sizes = [8, 1, 32], strides = [1, 1, 1]} : vector<8x8x32xf32> to vector<8x1x32xf32>
    %97 = vector.shape_cast %96 : vector<8x1x32xf32> to vector<8x32xf32>
    %98 = arith.truncf %97 : vector<8x32xf32> to vector<8x32xbf16>
    %c0_31 = arith.constant 0 : index
    %c0_32 = arith.constant 0 : index
    %99 = vector.load %arg8[%c0_31, %c0_32] : memref<32x64xbf16, #tpu.memory_space<vmem>>, vector<32x64xbf16>
    %cst_33 = arith.constant dense<0.000000e+00> : vector<8x64xf32>
    %100 = tpu.matmul %98, %99, %cst_33 {dimension_numbers = #tpu.dot_dimension_numbers<[1], [0], [0], [1], [0, 0, 1, 1], [], []>} : vector<8x32xbf16>, vector<32x64xbf16>, vector<8x64xf32> -> vector<8x64xf32>
    %c0_34 = arith.constant 0 : index
    %c0_35 = arith.constant 0 : index
    %101 = vector.load %arg9[%c0_34, %c0_35] : memref<1x64xf32, #tpu.memory_space<vmem>>, vector<1x64xf32>
    %102 = vector.broadcast %101 : vector<1x64xf32> to vector<8x64xf32>
    %103 = arith.addf %100, %102 : vector<8x64xf32>
    %104 = arith.mulf %103, %103 : vector<8x64xf32>
    %105 = arith.mulf %103, %104 : vector<8x64xf32>
    %cst_36 = arith.constant 4.471500e-02 : f32
    %106 = vector.broadcast %cst_36 : f32 to vector<8x64xf32>
    %107 = arith.mulf %106, %105 : vector<8x64xf32>
    %108 = arith.addf %103, %107 : vector<8x64xf32>
    %cst_37 = arith.constant 0.797884583 : f32
    %109 = vector.broadcast %cst_37 : f32 to vector<8x64xf32>
    %110 = arith.mulf %109, %108 : vector<8x64xf32>
    %111 = math.tanh %110 : vector<8x64xf32>
    %cst_38 = arith.constant 1.000000e+00 : f32
    %112 = vector.broadcast %cst_38 : f32 to vector<8x64xf32>
    %113 = arith.addf %112, %111 : vector<8x64xf32>
    %cst_39 = arith.constant 5.000000e-01 : f32
    %114 = vector.broadcast %cst_39 : f32 to vector<8x64xf32>
    %115 = arith.mulf %114, %113 : vector<8x64xf32>
    %116 = arith.mulf %103, %115 : vector<8x64xf32>
    %117 = arith.truncf %116 : vector<8x64xf32> to vector<8x64xbf16>
    %c0_40 = arith.constant 0 : index
    %c0_41 = arith.constant 0 : index
    %118 = vector.load %arg10[%c0_40, %c0_41] : memref<64x32xbf16, #tpu.memory_space<vmem>>, vector<64x32xbf16>
    %cst_42 = arith.constant dense<0.000000e+00> : vector<8x32xf32>
    %119 = tpu.matmul %117, %118, %cst_42 {dimension_numbers = #tpu.dot_dimension_numbers<[1], [0], [0], [1], [0, 0, 1, 1], [], []>} : vector<8x64xbf16>, vector<64x32xbf16>, vector<8x32xf32> -> vector<8x32xf32>
    %c0_43 = arith.constant 0 : index
    %c0_44 = arith.constant 0 : index
    %120 = vector.load %arg11[%c0_43, %c0_44] : memref<1x32xf32, #tpu.memory_space<vmem>>, vector<1x32xf32>
    %121 = vector.broadcast %120 : vector<1x32xf32> to vector<8x32xf32>
    %122 = arith.addf %119, %121 : vector<8x32xf32>
    %123 = arith.addf %97, %122 : vector<8x32xf32>
    %124 = vector.extract_strided_slice %0 {offsets = [2, 0, 0], sizes = [1, 1, 32], strides = [1, 1, 1]} : vector<3x2x32xf32> to vector<1x1x32xf32>
    %125 = vector.shape_cast %124 : vector<1x1x32xf32> to vector<1x32xf32>
    %126 = vector.extract_strided_slice %0 {offsets = [2, 1, 0], sizes = [1, 1, 32], strides = [1, 1, 1]} : vector<3x2x32xf32> to vector<1x1x32xf32>
    %127 = vector.shape_cast %126 : vector<1x1x32xf32> to vector<1x32xf32>
    %cst_45 = arith.constant dense<0.000000e+00> : vector<8xf32>
    %128 = vector.multi_reduction <add>, %123, %cst_45 [1] : vector<8x32xf32> to vector<8xf32>
    %129 = vector.shape_cast %128 : vector<8xf32> to vector<8x1xf32>
    %cst_46 = arith.constant 3.200000e+01 : f32
    %130 = vector.broadcast %cst_46 : f32 to vector<8x1xf32>
    %131 = arith.divf %129, %130 : vector<8x1xf32>
    %132 = vector.broadcast %131 : vector<8x1xf32> to vector<8x32xf32>
    %133 = arith.subf %123, %132 : vector<8x32xf32>
    %134 = arith.mulf %133, %133 : vector<8x32xf32>
    %cst_47 = arith.constant dense<0.000000e+00> : vector<8xf32>
    %135 = vector.multi_reduction <add>, %134, %cst_47 [1] : vector<8x32xf32> to vector<8xf32>
    %136 = vector.shape_cast %135 : vector<8xf32> to vector<8x1xf32>
    %cst_48 = arith.constant 3.200000e+01 : f32
    %137 = vector.broadcast %cst_48 : f32 to vector<8x1xf32>
    %138 = arith.divf %136, %137 : vector<8x1xf32>
    %139 = vector.broadcast %131 : vector<8x1xf32> to vector<8x32xf32>
    %140 = arith.subf %123, %139 : vector<8x32xf32>
    %cst_49 = arith.constant 9.99999996E-13 : f32
    %141 = vector.broadcast %cst_49 : f32 to vector<8x1xf32>
    %142 = arith.addf %138, %141 : vector<8x1xf32>
    %143 = math.rsqrt %142 : vector<8x1xf32>
    %144 = vector.broadcast %143 : vector<8x1xf32> to vector<8x32xf32>
    %145 = arith.mulf %140, %144 : vector<8x32xf32>
    %146 = vector.broadcast %125 : vector<1x32xf32> to vector<8x32xf32>
    %147 = arith.mulf %145, %146 : vector<8x32xf32>
    %148 = vector.broadcast %127 : vector<1x32xf32> to vector<8x32xf32>
    %149 = arith.addf %147, %148 : vector<8x32xf32>
    %150 = arith.truncf %149 : vector<8x32xf32> to vector<8x32xbf16>
    %c0_50 = arith.constant 0 : index
    %c0_51 = arith.constant 0 : index
    %151 = vector.load %arg12[%c0_50, %c0_51] : memref<32x32xbf16, #tpu.memory_space<vmem>>, vector<32x32xbf16>
    %cst_52 = arith.constant dense<0.000000e+00> : vector<8x32xf32>
    %152 = tpu.matmul %150, %151, %cst_52 {dimension_numbers = #tpu.dot_dimension_numbers<[1], [0], [0], [1], [0, 0, 1, 1], [], []>} : vector<8x32xbf16>, vector<32x32xbf16>, vector<8x32xf32> -> vector<8x32xf32>
    %c0_53 = arith.constant 0 : index
    %c0_54 = arith.constant 0 : index
    %153 = vector.load %arg13[%c0_53, %c0_54] : memref<1x32xf32, #tpu.memory_space<vmem>>, vector<1x32xf32>
    %154 = vector.broadcast %153 : vector<1x32xf32> to vector<8x32xf32>
    %155 = arith.addf %152, %154 : vector<8x32xf32>
    %156 = math.tanh %155 : vector<8x32xf32>
    %c0_55 = arith.constant 0 : index
    %c0_56 = arith.constant 0 : index
    %157 = vector.load %arg14[%c0_55, %c0_56] : memref<32x128xbf16, #tpu.memory_space<vmem>>, vector<32x128xbf16>
    %c0_57 = arith.constant 0 : index
    %c0_58 = arith.constant 0 : index
    %158 = vector.load %arg15[%c0_57, %c0_58] : memref<32x128xbf16, #tpu.memory_space<vmem>>, vector<32x128xbf16>
    %c0_59 = arith.constant 0 : index
    %c0_60 = arith.constant 0 : index
    %159 = vector.load %arg16[%c0_59, %c0_60] : memref<1x128xf32, #tpu.memory_space<vmem>>, vector<1x128xf32>
    %c0_61 = arith.constant 0 : index
    %c0_62 = arith.constant 0 : index
    %160 = vector.load %arg2[%c0_61, %c0_62] : memref<2x4xf32, #tpu.memory_space<vmem>>, vector<2x4xf32>
    %cst_63 = arith.constant 0.000000e+00 : f32
    %161 = vector.broadcast %cst_63 : f32 to vector<2x32xf32>
    %cst_64 = arith.constant 0.000000e+00 : f32
    %162 = vector.broadcast %cst_64 : f32 to vector<2x32xf32>
    %cst_65 = arith.constant 0.000000e+00 : f32
    %163 = vector.broadcast %cst_65 : f32 to vector<2x32xf32>
    %164 = vector.extract_strided_slice %156 {offsets = [0, 0], sizes = [2, 32], strides = [1, 1]} : vector<8x32xf32> to vector<2x32xf32>
    %165 = arith.truncf %164 : vector<2x32xf32> to vector<2x32xbf16>
    %cst_66 = arith.constant dense<0.000000e+00> : vector<2x128xf32>
    %166 = tpu.matmul %165, %157, %cst_66 {dimension_numbers = #tpu.dot_dimension_numbers<[1], [0], [0], [1], [0, 0, 1, 1], [], []>} : vector<2x32xbf16>, vector<32x128xbf16>, vector<2x128xf32> -> vector<2x128xf32>
    %167 = arith.truncf %161 : vector<2x32xf32> to vector<2x32xbf16>
    %cst_67 = arith.constant dense<0.000000e+00> : vector<2x128xf32>
    %168 = tpu.matmul %167, %158, %cst_67 {dimension_numbers = #tpu.dot_dimension_numbers<[1], [0], [0], [1], [0, 0, 1, 1], [], []>} : vector<2x32xbf16>, vector<32x128xbf16>, vector<2x128xf32> -> vector<2x128xf32>
    %169 = arith.addf %166, %168 : vector<2x128xf32>
    %170 = vector.broadcast %159 : vector<1x128xf32> to vector<2x128xf32>
    %171 = arith.addf %169, %170 : vector<2x128xf32>
    %172 = vector.extract_strided_slice %171 {offsets = [0, 0], sizes = [2, 32], strides = [1, 1]} : vector<2x128xf32> to vector<2x32xf32>
    %173 = arith.negf %172 : vector<2x32xf32>
    %174 = math.exp %173 : vector<2x32xf32>
    %cst_68 = arith.constant 1.000000e+00 : f32
    %175 = vector.broadcast %cst_68 : f32 to vector<2x32xf32>
    %176 = arith.addf %175, %174 : vector<2x32xf32>
    %177 = arith.divf %175, %176 : vector<2x32xf32>
    %178 = vector.extract_strided_slice %171 {offsets = [0, 32], sizes = [2, 32], strides = [1, 1]} : vector<2x128xf32> to vector<2x32xf32>
    %179 = arith.negf %178 : vector<2x32xf32>
    %180 = math.exp %179 : vector<2x32xf32>
    %cst_69 = arith.constant 1.000000e+00 : f32
    %181 = vector.broadcast %cst_69 : f32 to vector<2x32xf32>
    %182 = arith.addf %181, %180 : vector<2x32xf32>
    %183 = arith.divf %181, %182 : vector<2x32xf32>
    %184 = vector.extract_strided_slice %171 {offsets = [0, 64], sizes = [2, 32], strides = [1, 1]} : vector<2x128xf32> to vector<2x32xf32>
    %185 = math.tanh %184 : vector<2x32xf32>
    %186 = vector.extract_strided_slice %171 {offsets = [0, 96], sizes = [2, 32], strides = [1, 1]} : vector<2x128xf32> to vector<2x32xf32>
    %187 = arith.negf %186 : vector<2x32xf32>
    %188 = math.exp %187 : vector<2x32xf32>
    %cst_70 = arith.constant 1.000000e+00 : f32
    %189 = vector.broadcast %cst_70 : f32 to vector<2x32xf32>
    %190 = arith.addf %189, %188 : vector<2x32xf32>
    %191 = arith.divf %189, %190 : vector<2x32xf32>
    %192 = arith.mulf %183, %162 : vector<2x32xf32>
    %193 = arith.mulf %177, %185 : vector<2x32xf32>
    %194 = arith.addf %192, %193 : vector<2x32xf32>
    %195 = math.tanh %194 : vector<2x32xf32>
    %196 = arith.mulf %191, %195 : vector<2x32xf32>
    %197 = vector.extract_strided_slice %160 {offsets = [0, 0], sizes = [2, 1], strides = [1, 1]} : vector<2x4xf32> to vector<2x1xf32>
    %198 = vector.broadcast %197 : vector<2x1xf32> to vector<2x32xf32>
    %199 = arith.mulf %198, %196 : vector<2x32xf32>
    %200 = arith.addf %163, %199 : vector<2x32xf32>
    %201 = vector.extract_strided_slice %156 {offsets = [2, 0], sizes = [2, 32], strides = [1, 1]} : vector<8x32xf32> to vector<2x32xf32>
    %202 = arith.truncf %201 : vector<2x32xf32> to vector<2x32xbf16>
    %cst_71 = arith.constant dense<0.000000e+00> : vector<2x128xf32>
    %203 = tpu.matmul %202, %157, %cst_71 {dimension_numbers = #tpu.dot_dimension_numbers<[1], [0], [0], [1], [0, 0, 1, 1], [], []>} : vector<2x32xbf16>, vector<32x128xbf16>, vector<2x128xf32> -> vector<2x128xf32>
    %204 = arith.truncf %196 : vector<2x32xf32> to vector<2x32xbf16>
    %cst_72 = arith.constant dense<0.000000e+00> : vector<2x128xf32>
    %205 = tpu.matmul %204, %158, %cst_72 {dimension_numbers = #tpu.dot_dimension_numbers<[1], [0], [0], [1], [0, 0, 1, 1], [], []>} : vector<2x32xbf16>, vector<32x128xbf16>, vector<2x128xf32> -> vector<2x128xf32>
    %206 = arith.addf %203, %205 : vector<2x128xf32>
    %207 = vector.broadcast %159 : vector<1x128xf32> to vector<2x128xf32>
    %208 = arith.addf %206, %207 : vector<2x128xf32>
    %209 = vector.extract_strided_slice %208 {offsets = [0, 0], sizes = [2, 32], strides = [1, 1]} : vector<2x128xf32> to vector<2x32xf32>
    %210 = arith.negf %209 : vector<2x32xf32>
    %211 = math.exp %210 : vector<2x32xf32>
    %cst_73 = arith.constant 1.000000e+00 : f32
    %212 = vector.broadcast %cst_73 : f32 to vector<2x32xf32>
    %213 = arith.addf %212, %211 : vector<2x32xf32>
    %214 = arith.divf %212, %213 : vector<2x32xf32>
    %215 = vector.extract_strided_slice %208 {offsets = [0, 32], sizes = [2, 32], strides = [1, 1]} : vector<2x128xf32> to vector<2x32xf32>
    %216 = arith.negf %215 : vector<2x32xf32>
    %217 = math.exp %216 : vector<2x32xf32>
    %cst_74 = arith.constant 1.000000e+00 : f32
    %218 = vector.broadcast %cst_74 : f32 to vector<2x32xf32>
    %219 = arith.addf %218, %217 : vector<2x32xf32>
    %220 = arith.divf %218, %219 : vector<2x32xf32>
    %221 = vector.extract_strided_slice %208 {offsets = [0, 64], sizes = [2, 32], strides = [1, 1]} : vector<2x128xf32> to vector<2x32xf32>
    %222 = math.tanh %221 : vector<2x32xf32>
    %223 = vector.extract_strided_slice %208 {offsets = [0, 96], sizes = [2, 32], strides = [1, 1]} : vector<2x128xf32> to vector<2x32xf32>
    %224 = arith.negf %223 : vector<2x32xf32>
    %225 = math.exp %224 : vector<2x32xf32>
    %cst_75 = arith.constant 1.000000e+00 : f32
    %226 = vector.broadcast %cst_75 : f32 to vector<2x32xf32>
    %227 = arith.addf %226, %225 : vector<2x32xf32>
    %228 = arith.divf %226, %227 : vector<2x32xf32>
    %229 = arith.mulf %220, %194 : vector<2x32xf32>
    %230 = arith.mulf %214, %222 : vector<2x32xf32>
    %231 = arith.addf %229, %230 : vector<2x32xf32>
    %232 = math.tanh %231 : vector<2x32xf32>
    %233 = arith.mulf %228, %232 : vector<2x32xf32>
    %234 = vector.extract_strided_slice %160 {offsets = [0, 1], sizes = [2, 1], strides = [1, 1]} : vector<2x4xf32> to vector<2x1xf32>
    %235 = vector.broadcast %234 : vector<2x1xf32> to vector<2x32xf32>
    %236 = arith.mulf %235, %233 : vector<2x32xf32>
    %237 = arith.addf %200, %236 : vector<2x32xf32>
    %238 = vector.extract_strided_slice %156 {offsets = [4, 0], sizes = [2, 32], strides = [1, 1]} : vector<8x32xf32> to vector<2x32xf32>
    %239 = arith.truncf %238 : vector<2x32xf32> to vector<2x32xbf16>
    %cst_76 = arith.constant dense<0.000000e+00> : vector<2x128xf32>
    %240 = tpu.matmul %239, %157, %cst_76 {dimension_numbers = #tpu.dot_dimension_numbers<[1], [0], [0], [1], [0, 0, 1, 1], [], []>} : vector<2x32xbf16>, vector<32x128xbf16>, vector<2x128xf32> -> vector<2x128xf32>
    %241 = arith.truncf %233 : vector<2x32xf32> to vector<2x32xbf16>
    %cst_77 = arith.constant dense<0.000000e+00> : vector<2x128xf32>
    %242 = tpu.matmul %241, %158, %cst_77 {dimension_numbers = #tpu.dot_dimension_numbers<[1], [0], [0], [1], [0, 0, 1, 1], [], []>} : vector<2x32xbf16>, vector<32x128xbf16>, vector<2x128xf32> -> vector<2x128xf32>
    %243 = arith.addf %240, %242 : vector<2x128xf32>
    %244 = vector.broadcast %159 : vector<1x128xf32> to vector<2x128xf32>
    %245 = arith.addf %243, %244 : vector<2x128xf32>
    %246 = vector.extract_strided_slice %245 {offsets = [0, 0], sizes = [2, 32], strides = [1, 1]} : vector<2x128xf32> to vector<2x32xf32>
    %247 = arith.negf %246 : vector<2x32xf32>
    %248 = math.exp %247 : vector<2x32xf32>
    %cst_78 = arith.constant 1.000000e+00 : f32
    %249 = vector.broadcast %cst_78 : f32 to vector<2x32xf32>
    %250 = arith.addf %249, %248 : vector<2x32xf32>
    %251 = arith.divf %249, %250 : vector<2x32xf32>
    %252 = vector.extract_strided_slice %245 {offsets = [0, 32], sizes = [2, 32], strides = [1, 1]} : vector<2x128xf32> to vector<2x32xf32>
    %253 = arith.negf %252 : vector<2x32xf32>
    %254 = math.exp %253 : vector<2x32xf32>
    %cst_79 = arith.constant 1.000000e+00 : f32
    %255 = vector.broadcast %cst_79 : f32 to vector<2x32xf32>
    %256 = arith.addf %255, %254 : vector<2x32xf32>
    %257 = arith.divf %255, %256 : vector<2x32xf32>
    %258 = vector.extract_strided_slice %245 {offsets = [0, 64], sizes = [2, 32], strides = [1, 1]} : vector<2x128xf32> to vector<2x32xf32>
    %259 = math.tanh %258 : vector<2x32xf32>
    %260 = vector.extract_strided_slice %245 {offsets = [0, 96], sizes = [2, 32], strides = [1, 1]} : vector<2x128xf32> to vector<2x32xf32>
    %261 = arith.negf %260 : vector<2x32xf32>
    %262 = math.exp %261 : vector<2x32xf32>
    %cst_80 = arith.constant 1.000000e+00 : f32
    %263 = vector.broadcast %cst_80 : f32 to vector<2x32xf32>
    %264 = arith.addf %263, %262 : vector<2x32xf32>
    %265 = arith.divf %263, %264 : vector<2x32xf32>
    %266 = arith.mulf %257, %231 : vector<2x32xf32>
    %267 = arith.mulf %251, %259 : vector<2x32xf32>
    %268 = arith.addf %266, %267 : vector<2x32xf32>
    %269 = math.tanh %268 : vector<2x32xf32>
    %270 = arith.mulf %265, %269 : vector<2x32xf32>
    %271 = vector.extract_strided_slice %160 {offsets = [0, 2], sizes = [2, 1], strides = [1, 1]} : vector<2x4xf32> to vector<2x1xf32>
    %272 = vector.broadcast %271 : vector<2x1xf32> to vector<2x32xf32>
    %273 = arith.mulf %272, %270 : vector<2x32xf32>
    %274 = arith.addf %237, %273 : vector<2x32xf32>
    %275 = vector.extract_strided_slice %156 {offsets = [6, 0], sizes = [2, 32], strides = [1, 1]} : vector<8x32xf32> to vector<2x32xf32>
    %276 = arith.truncf %275 : vector<2x32xf32> to vector<2x32xbf16>
    %cst_81 = arith.constant dense<0.000000e+00> : vector<2x128xf32>
    %277 = tpu.matmul %276, %157, %cst_81 {dimension_numbers = #tpu.dot_dimension_numbers<[1], [0], [0], [1], [0, 0, 1, 1], [], []>} : vector<2x32xbf16>, vector<32x128xbf16>, vector<2x128xf32> -> vector<2x128xf32>
    %278 = arith.truncf %270 : vector<2x32xf32> to vector<2x32xbf16>
    %cst_82 = arith.constant dense<0.000000e+00> : vector<2x128xf32>
    %279 = tpu.matmul %278, %158, %cst_82 {dimension_numbers = #tpu.dot_dimension_numbers<[1], [0], [0], [1], [0, 0, 1, 1], [], []>} : vector<2x32xbf16>, vector<32x128xbf16>, vector<2x128xf32> -> vector<2x128xf32>
    %280 = arith.addf %277, %279 : vector<2x128xf32>
    %281 = vector.broadcast %159 : vector<1x128xf32> to vector<2x128xf32>
    %282 = arith.addf %280, %281 : vector<2x128xf32>
    %283 = vector.extract_strided_slice %282 {offsets = [0, 0], sizes = [2, 32], strides = [1, 1]} : vector<2x128xf32> to vector<2x32xf32>
    %284 = arith.negf %283 : vector<2x32xf32>
    %285 = math.exp %284 : vector<2x32xf32>
    %cst_83 = arith.constant 1.000000e+00 : f32
    %286 = vector.broadcast %cst_83 : f32 to vector<2x32xf32>
    %287 = arith.addf %286, %285 : vector<2x32xf32>
    %288 = arith.divf %286, %287 : vector<2x32xf32>
    %289 = vector.extract_strided_slice %282 {offsets = [0, 32], sizes = [2, 32], strides = [1, 1]} : vector<2x128xf32> to vector<2x32xf32>
    %290 = arith.negf %289 : vector<2x32xf32>
    %291 = math.exp %290 : vector<2x32xf32>
    %cst_84 = arith.constant 1.000000e+00 : f32
    %292 = vector.broadcast %cst_84 : f32 to vector<2x32xf32>
    %293 = arith.addf %292, %291 : vector<2x32xf32>
    %294 = arith.divf %292, %293 : vector<2x32xf32>
    %295 = vector.extract_strided_slice %282 {offsets = [0, 64], sizes = [2, 32], strides = [1, 1]} : vector<2x128xf32> to vector<2x32xf32>
    %296 = math.tanh %295 : vector<2x32xf32>
    %297 = vector.extract_strided_slice %282 {offsets = [0, 96], sizes = [2, 32], strides = [1, 1]} : vector<2x128xf32> to vector<2x32xf32>
    %298 = arith.negf %297 : vector<2x32xf32>
    %299 = math.exp %298 : vector<2x32xf32>
    %cst_85 = arith.constant 1.000000e+00 : f32
    %300 = vector.broadcast %cst_85 : f32 to vector<2x32xf32>
    %301 = arith.addf %300, %299 : vector<2x32xf32>
    %302 = arith.divf %300, %301 : vector<2x32xf32>
    %303 = arith.mulf %294, %268 : vector<2x32xf32>
    %304 = arith.mulf %288, %296 : vector<2x32xf32>
    %305 = arith.addf %303, %304 : vector<2x32xf32>
    %306 = math.tanh %305 : vector<2x32xf32>
    %307 = arith.mulf %302, %306 : vector<2x32xf32>
    %308 = vector.extract_strided_slice %160 {offsets = [0, 3], sizes = [2, 1], strides = [1, 1]} : vector<2x4xf32> to vector<2x1xf32>
    %309 = vector.broadcast %308 : vector<2x1xf32> to vector<2x32xf32>
    %310 = arith.mulf %309, %307 : vector<2x32xf32>
    %311 = arith.addf %274, %310 : vector<2x32xf32>
    %312 = arith.truncf %311 : vector<2x32xf32> to vector<2x32xbf16>
    %c0_86 = arith.constant 0 : index
    %c0_87 = arith.constant 0 : index
    %313 = vector.load %arg17[%c0_86, %c0_87] : memref<32x16xbf16, #tpu.memory_space<vmem>>, vector<32x16xbf16>
    %cst_88 = arith.constant dense<0.000000e+00> : vector<2x16xf32>
    %314 = tpu.matmul %312, %313, %cst_88 {dimension_numbers = #tpu.dot_dimension_numbers<[1], [0], [0], [1], [0, 0, 1, 1], [], []>} : vector<2x32xbf16>, vector<32x16xbf16>, vector<2x16xf32> -> vector<2x16xf32>
    %c0_89 = arith.constant 0 : index
    %c0_90 = arith.constant 0 : index
    %315 = vector.load %arg18[%c0_89, %c0_90] : memref<1x16xf32, #tpu.memory_space<vmem>>, vector<1x16xf32>
    %316 = vector.broadcast %315 : vector<1x16xf32> to vector<2x16xf32>
    %317 = arith.addf %314, %316 : vector<2x16xf32>
    %318 = arith.truncf %317 : vector<2x16xf32> to vector<2x16xbf16>
    %c0_91 = arith.constant 0 : index
    %c0_92 = arith.constant 0 : index
    %319 = vector.load %arg19[%c0_91, %c0_92] : memref<16x3xbf16, #tpu.memory_space<vmem>>, vector<16x3xbf16>
    %cst_93 = arith.constant dense<0.000000e+00> : vector<2x3xf32>
    %320 = tpu.matmul %318, %319, %cst_93 {dimension_numbers = #tpu.dot_dimension_numbers<[1], [0], [0], [1], [0, 0, 1, 1], [], []>} : vector<2x16xbf16>, vector<16x3xbf16>, vector<2x3xf32> -> vector<2x3xf32>
    %c0_94 = arith.constant 0 : index
    %c0_95 = arith.constant 0 : index
    %321 = vector.load %arg20[%c0_94, %c0_95] : memref<1x3xf32, #tpu.memory_space<vmem>>, vector<1x3xf32>
    %322 = vector.broadcast %321 : vector<1x3xf32> to vector<2x3xf32>
    %323 = arith.addf %320, %322 : vector<2x3xf32>
    %c0_96 = arith.constant 0 : index
    %c0_97 = arith.constant 0 : index
    %324 = vector.load %arg21[%c0_96, %c0_97] : memref<2x3xf32, #tpu.memory_space<vmem>>, vector<2x3xf32>
    tpu.vector_store %arg21[%c0_96, %c0_97], %323 {strides = array<i32>} : memref<2x3xf32, #tpu.memory_space<vmem>>, vector<2x3xf32>,
    return
  }
}

</mosaic_0001>

<bundles_post_ra>
// kernel: robert_forward.1
= control target key start
LH: loop header
LB: loop body
LE: loop exit
PB: predicated region body
PF: predicated region fallthrough
CT: control target
= control target key end

     0   :  { %s4008_s0 = inlined_call_operand.vmem [shape: f32[64,32], index: 0, kind: input, shape index: {}]   ;;  %s4009_s1 = inlined_call_operand.vmem [shape: f32[8,1,8], index: 1, kind: input, shape index: {}]   ;;  %s4010_s2 = inlined_call_operand.vmem [shape: f32[2,4], index: 2, kind: input, shape index: {}]   ;;  %s4011_s3 = inlined_call_operand.vmem [shape: bf16[32,96], index: 3, kind: input, shape index: {}]   ;;  %s4012_s4 = inlined_call_operand.vmem [shape: f32[1,96], index: 4, kind: input, shape index: {}]   ;;  %s4013_s5 = inlined_call_operand.vmem [shape: bf16[32,32], index: 5, kind: input, shape index: {}]   ;;  %s4014_s6 = inlined_call_operand.vmem [shape: f32[1,32], index: 6, kind: input, shape index: {}]   ;;  %s4015_s7 = inlined_call_operand.vmem [shape: f32[3,2,32], index: 7, kind: input, shape index: {}]   ;;  %s4016_s8 = inlined_call_operand.vmem [shape: bf16[32,64], index: 8, kind: input, shape index: {}]   ;;  %s4017_s9 = inlined_call_operand.vmem [shape: f32[1,64], index: 9, kind: input, shape index: {}]   ;;  %s4018_s10 = inlined_call_operand.vmem [shape: bf16[64,32], index: 10, kind: input, shape index: {}]   ;;  %s4019_s11 = inlined_call_operand.vmem [shape: f32[1,32], index: 11, kind: input, shape index: {}]   ;;  %s4020_s12 = inlined_call_operand.vmem [shape: bf16[32,32], index: 12, kind: input, shape index: {}]   ;;  %s4021_s13 = inlined_call_operand.vmem [shape: f32[1,32], index: 13, kind: input, shape index: {}]   ;;  %s4022_s14 = inlined_call_operand.vmem [shape: bf16[32,128], index: 14, kind: input, shape index: {}]   ;;  %s4023_s15 = inlined_call_operand.vmem [shape: bf16[32,128], index: 15, kind: input, shape index: {}]   ;;  %s4024_s16 = inlined_call_operand.vmem [shape: f32[1,128], index: 16, kind: input, shape index: {}]   ;;  %s4025_s17 = inlined_call_operand.vmem [shape: bf16[32,16], index: 17, kind: input, shape index: {}]   ;;  %s4026_s18 = inlined_call_operand.vmem [shape: f32[1,16], index: 18, kind: input, shape index: {}]   ;;  %s4027_s19 = inlined_call_operand.vmem [shape: bf16[16,3], index: 19, kind: input, shape index: {}]   ;;  %s4028_s20 = inlined_call_operand.vmem [shape: f32[1,3], index: 20, kind: input, shape index: {}]   ;;  %s4029_s21 = inlined_call_operand.hbm [shape: f32[2,3], index: 21, kind: output, shape index: {}]  }
   0x1   :  { %4034 = sst [smem:[#allocation5_spill]] %s4008_s0 }
   0x2   :  { %4035 = sst [smem:[#allocation6_spill]] %s4009_s1 }
   0x3   :  { %4036 = sst [smem:[#allocation7_spill]] %s4010_s2 }
   0x4   :  { %4037 = sst [smem:[#allocation8_spill]] %s4011_s3 }
   0x5   :  { %4038 = sst [smem:[#allocation9_spill]] %s4012_s4 }
   0x6   :  { %4039 = sst [smem:[#allocation10_spill]] %s4013_s5 }
   0x7   :  { %s4040_s26 = sld [smem:[#allocation5_spill]]  ;;  %vm81_vm0 = vcmask 261120  }
   0xd   :  { %v73_v0 = vld [vmem:[%s4040_s26] sm:$0xff]  ;;  %v75_v1 = vld [vmem:[%s4040_s26 + $0x10] sm:$0xff]  ;;  %v74_v2 = vld [vmem:[%s4040_s26 + $0x8] sm:$0xff] }
   0xe   :  { %v82_v3 = vsel %vm81_vm0, %v73_v0, 0.0  ;;  %v88_v4 = vsel %vm81_vm0, %v75_v1, 0.0  ;;  %v76_v5 = vld [vmem:[%s4040_s26 + $0x18] sm:$0xff]  ;;  %v77_v6 = vld [vmem:[%s4040_s26 + $0x20] sm:$0xff]  ;;  %v78_v7 = vld [vmem:[%s4040_s26 + $0x28] sm:$0xff]  ;;  %v85_v8 = vsel %vm81_vm0, %v74_v2, 0.0 }
   0xf   :  { %83 = vadd.xlane.f32.xlu0 %v82_v3  ;;  %89 = vadd.xlane.f32.xlu1 %v88_v4  ;;  %v91_v9 = vsel %vm81_vm0, %v76_v5, 0.0  ;;  %v94_v10 = vsel %vm81_vm0, %v77_v6, 0.0  ;;  %v97_v11 = vsel %vm81_vm0, %v78_v7, 0.0  ;;  %v79_v12 = vld [vmem:[%s4040_s26 + $0x30] sm:$0xff]  ;;  %v80_v13 = vld [vmem:[%s4040_s26 + $0x38] sm:$0xff] }
  0x10   :  { %v100_v14 = vsel %vm81_vm0, %v79_v12, 0.0  ;;  %v103_v15 = vsel %vm81_vm0, %v80_v13, 0.0 }
  0x13   :  { %86 = vadd.xlane.f32.xlu0 %v85_v8  ;;  %92 = vadd.xlane.f32.xlu1 %v91_v9 }
  0x17   :  { %95 = vadd.xlane.f32.xlu0 %v94_v10  ;;  %98 = vadd.xlane.f32.xlu1 %v97_v11 }
  0x1b   :  { %101 = vadd.xlane.f32.xlu0 %v100_v14  ;;  %104 = vadd.xlane.f32.xlu1 %v103_v15 }
  0x1c   :  { %26 = vsyncpa [#allocation3], 0  ;;  %s4041_s3 = sld [smem:[#allocation8_spill]]  ;;  %v187_v63 = vlaneseq  ;;  %s4042_s22 = sld [smem:[#allocation9_spill]]  ;;  %vm3197_vm1 = vmmov 0   ;;  %vm787_vm2 = vcmask 64512  }
  0x1d   :  { %s3198_s23 = smov 96   ;;  %s4043_s2 = sld [smem:[#allocation6_spill]]  ;;  %vm889_vm3 = vcmask 1043456   ;;  %vm1545_vm4 = vcmask 1041409   ;;  %vm1548_vm5 = vcmask 1042434   ;;  %vm1551_vm6 = vcmask 1043459  }
  0x1e   :  { %s4044_s27 = sld [smem:[#allocation10_spill]]  ;;  %vm1554_vm7 = vcmask 1044484   ;;  %vm1557_vm8 = vcmask 1045509   ;;  %vm1560_vm9 = vcmask 1046534   ;;  %vm1563_vm10 = vcmask 1047559   ;;  %s4045_s29 = sld [smem:[#allocation7_spill]] }
  0x1f   :  { %vm1670_vm11 = vcmask 523264   ;;  %vm2592_vm12 = vcmask 130048   ;;  %vm2636_vm13 = vcmask 17408  }
  0x22   :  { %v3051_v56 = vld [vmem:[%s4041_s3] sm:$0xff]   ;;  %v3052_v57 = vld [vmem:[%s4041_s3 + $0x8] sm:$0xff]  }
  0x23   :  { %2811 = vmatprep.subr.bf16.mxu0 %v3051_v56 }
  0x24   :  { %2812 = vmatpush3.bf16.msra.mxu0 %v3051_v56 }
  0x25   :  { %2813 = vmatprep.subr.bf16.mxu0 %v3052_v57 }
  0x28   :  { %2814 = vmatpush3.bf16.msra.mxu0 %v3052_v57 }
  0x9c   :  { %v84_v16 = vpop.xlane.xlu0 %83  ;;  %v90_v17 = vpop.xlane.xlu1 %89 }
  0x9d   :  { %v107_v18 = vmul.f32 0.03125, %v84_v16  ;;  %v109_v19 = vmul.f32 0.03125, %v90_v17  ;;  %v70_v16 = vld [vmem:[%s4015_s7] sm:$0x3] }
  0x9f   :  { %v3348_v20 = vsub.f32 %v73_v0, %v107_v18  ;;  %v3350_v21 = vsub.f32 %v75_v1, %v109_v19 }
  0xa0   :  { %v87_v22 = vpop.xlane.xlu0 %86  ;;  %v93_v23 = vpop.xlane.xlu1 %92 }
  0xa1   :  { %v108_v24 = vmul.f32 0.03125, %v87_v22  ;;  %v110_v25 = vmul.f32 0.03125, %v93_v23  ;;  %v123_v26 = vmul.f32 %v3348_v20, %v3348_v20  ;;  %v125_v27 = vmul.f32 %v3350_v21, %v3350_v21 }
  0xa3   :  { %v3356_v28 = vsub.f32 %v74_v2, %v108_v24  ;;  %v3358_v29 = vsub.f32 %v76_v5, %v110_v25  ;;  %v131_v30 = vsel %vm81_vm0, %v123_v26, 0.0  ;;  %v137_v33 = vsel %vm81_vm0, %v125_v27, 0.0 }
  0xa4   :  { %132 = vadd.xlane.f32.xlu0 %v131_v30  ;;  %v96_v31 = vpop.xlane.xlu0 %95  ;;  %v99_v32 = vpop.xlane.xlu1 %98 }
  0xa5   :  { %v111_v34 = vmul.f32 0.03125, %v96_v31  ;;  %v112_v35 = vmul.f32 0.03125, %v99_v32  ;;  %v124_v36 = vmul.f32 %v3356_v28, %v3356_v28  ;;  %v126_v37 = vmul.f32 %v3358_v29, %v3358_v29 }
  0xa7   :  { %v3366_v38 = vsub.f32 %v77_v6, %v111_v34  ;;  %v3368_v39 = vsub.f32 %v78_v7, %v112_v35  ;;  %v134_v40 = vsel %vm81_vm0, %v124_v36, 0.0  ;;  %v140_v43 = vsel %vm81_vm0, %v126_v37, 0.0 }
  0xa8   :  { %138 = vadd.xlane.f32.xlu0 %v137_v33  ;;  %135 = vadd.xlane.f32.xlu1 %v134_v40  ;;  %v102_v41 = vpop.xlane.xlu0 %101  ;;  %v105_v42 = vpop.xlane.xlu1 %104  ;;  %v188_v6 = vshrl.u32 %v187_v63, 7 }
  0xa9   :  { %v113_v44 = vmul.f32 0.03125, %v102_v41  ;;  %v114_v45 = vmul.f32 0.03125, %v105_v42  ;;  %v127_v46 = vmul.f32 %v3366_v38, %v3366_v38  ;;  %v128_v47 = vmul.f32 %v3368_v39, %v3368_v39 }
  0xaa   :  { %v3401_v25 = vsub.s32 1, %v188_v6 }
  0xab   :  { %v3376_v48 = vsub.f32 %v79_v12, %v113_v44  ;;  %v3378_v49 = vsub.f32 %v80_v13, %v114_v45  ;;  %v143_v50 = vsel %vm81_vm0, %v127_v46, 0.0  ;;  %v146_v51 = vsel %vm81_vm0, %v128_v47, 0.0 }
  0xac   :  { %141 = vadd.xlane.f32.xlu1 %v140_v43  ;;  %144 = vadd.xlane.f32.xlu0 %v143_v50  ;;  %v3394_v13 = vsub.s32 0, %v188_v6  ;;  %v202_v34 = vrot.slane %v70_v16, %v3401_v25 }
  0xad   :  { %v129_v52 = vmul.f32 %v3376_v48, %v3376_v48  ;;  %v130_v53 = vmul.f32 %v3378_v49, %v3378_v49 }
  0xae   :  { %v190_v24 = vrot.slane %v70_v16, %v3394_v13 }
  0xaf   :  { %v149_v54 = vsel %vm81_vm0, %v129_v52, 0.0  ;;  %v152_v55 = vsel %vm81_vm0, %v130_v53, 0.0 }
  0xb0   :  { %147 = vadd.xlane.f32.xlu1 %v146_v51  ;;  %150 = vadd.xlane.f32.xlu0 %v149_v54 }
  0xb4   :  { %153 = vadd.xlane.f32.xlu1 %v152_v55 }
 0x131   :  { %v133_v58 = vpop.xlane.xlu0 %132 }
 0x132   :  { %v155_v59 = vmul.f32 0.03125, %v133_v58 }
 0x134   :  { %v163_v60 = vadd.f32 1e-12, %v155_v59 }
 0x135   :  { %v136_v61 = vpop.xlane.xlu1 %135  ;;  %v139_v62 = vpop.xlane.xlu0 %138 }
 0x136   :  { %3070 = vrsqrt.f32 %v163_v60  ;;  %v156_v0 = vmul.f32 0.03125, %v136_v61  ;;  %v157_v1 = vmul.f32 0.03125, %v139_v62  ;;  %v3196_v61 = vmov 0.0   ;;  %v2652_v62 = vld [vmem:[%s4042_s22] ss:$0 sm:$0xff]  ;;  %s3199_s22 = smov 64  }
 0x137   :  { %2823 = vmatprep.subr.bf16.mxu1 %v3196_v61  ;;  %2835 = vmatprep.subr.bf16.mxu0 %v3196_v61 }
 0x138   :  { %v164_v2 = vadd.f32 1e-12, %v156_v0  ;;  %v165_v3 = vadd.f32 1e-12, %v157_v1  ;;  %2825 = vmatprep.mubr.msk.bf16.mxu1 %vm3197_vm1, %v3196_v61 }
 0x139   :  { %v142_v4 = vpop.xlane.xlu1 %141  ;;  %v145_v5 = vpop.xlane.xlu0 %144 }
 0x13a   :  { %3072 = vrsqrt.f32 %v164_v2  ;;  %v158_v7 = vmul.f32 0.03125, %v142_v4  ;;  %v159_v8 = vmul.f32 0.03125, %v145_v5 }
 0x13b   :  { %3074 = vrsqrt.f32 %v165_v3 }
 0x13c   :  { %v166_v9 = vadd.f32 1e-12, %v158_v7  ;;  %v167_v10 = vadd.f32 1e-12, %v159_v8 }
 0x13d   :  { %v148_v11 = vpop.xlane.xlu1 %147  ;;  %v151_v12 = vpop.xlane.xlu0 %150 }
 0x13e   :  { %3076 = vrsqrt.f32 %v166_v9  ;;  %v160_v14 = vmul.f32 0.03125, %v148_v11  ;;  %v161_v15 = vmul.f32 0.03125, %v151_v12 }
 0x13f   :  { %3078 = vrsqrt.f32 %v167_v10 }
 0x140   :  { %v3071_v17 = vpop.eup %3070  ;;  %v168_v18 = vadd.f32 1e-12, %v160_v14  ;;  %v169_v19 = vadd.f32 1e-12, %v161_v15 }
 0x141   :  { %v154_v22 = vpop.xlane.xlu1 %153  ;;  %v179_v23 = vmul.f32 %v3071_v17, %v3348_v20 }
 0x142   :  { %3080 = vrsqrt.f32 %v168_v18  ;;  %v162_v26 = vmul.f32 0.03125, %v154_v22 }
 0x143   :  { %3082 = vrsqrt.f32 %v169_v19  ;;  %v191_v33 = vmul.f32 %v190_v24, %v179_v23 }
 0x144   :  { %v3073_v27 = vpop.eup %3072  ;;  %v170_v30 = vadd.f32 1e-12, %v162_v26 }
 0x145   :  { %v3075_v31 = vpop.eup %3074  ;;  %v180_v32 = vmul.f32 %v3073_v27, %v3356_v28  ;;  %v3407_v41 = vadd.f32 %v202_v34, %v191_v33 }
 0x146   :  { %v181_v35 = vmul.f32 %v3075_v31, %v3350_v21  ;;  %3084 = vrsqrt.f32 %v170_v30 }
 0x147   :  { %v192_v36 = vmul.f32 %v190_v24, %v180_v32 }
 0x148   :  { %v3077_v20 = vpop.eup %3076  ;;  %v193_v43 = vmul.f32 %v190_v24, %v181_v35 }
 0x149   :  { %v3079_v37 = vpop.eup %3078  ;;  %v182_v40 = vmul.f32 %v3077_v20, %v3358_v29  ;;  %v3409_v42 = vadd.f32 %v202_v34, %v192_v36 }
 0x14a   :  { %v183_v44 = vmul.f32 %v3079_v37, %v3366_v38  ;;  %v3416_v50 = vadd.f32 %v202_v34, %v193_v43 }
 0x14b   :  { %v211_v28 = vpack.c.bf16 %v3409_v42, %v3407_v41  ;;  %v194_v45 = vmul.f32 %v190_v24, %v182_v40 }
 0x14c   :  { %v3081_v46 = vpop.eup %3080  ;;  %v195_v51 = vmul.f32 %v190_v24, %v183_v44 }
 0x14d   :  { %v3083_v47 = vpop.eup %3082  ;;  %v184_v21 = vmul.f32 %v3081_v46, %v3368_v39  ;;  %2815 = vmatprep.mubr.msk.bf16.mxu0 %vm81_vm0, %v211_v28  ;;  %v3418_v29 = vadd.f32 %v202_v34, %v194_v45 }
 0x14e   :  { %v185_v52 = vmul.f32 %v3083_v47, %v3376_v48  ;;  %v3425_v56 = vadd.f32 %v202_v34, %v195_v51 }
 0x14f   :  { %v212_v38 = vpack.c.bf16 %v3418_v29, %v3416_v50  ;;  %v196_v53 = vmul.f32 %v190_v24, %v184_v21 }
 0x150   :  { %v3085_v54 = vpop.eup %3084  ;;  %v197_v57 = vmul.f32 %v190_v24, %v185_v52 }
 0x151   :  { %v186_v55 = vmul.f32 %v3085_v54, %v3378_v49  ;;  %2816 = vmatmul.mubr.msk.bf16.vlgmr.msra.gmra.mrb[0].mxu0 %vm81_vm0, %v212_v38  ;;  %v3427_v39 = vadd.f32 %v202_v34, %v196_v53  ;;  %v2669_v53 = vld [vmem:[%s4043_s2 + $0x2] ss:$0 sm:$0xff] }
 0x152   :  { %v3432_v48 = vadd.f32 %v202_v34, %v197_v57 }
 0x153   :  { %v213_v58 = vpack.c.bf16 %v3427_v39, %v3425_v56  ;;  %v198_v59 = vmul.f32 %v190_v24, %v186_v55 }
 0x155   :  { %2819 = vmatprep.mubr.msk.bf16.mxu0 %vm81_vm0, %v213_v58  ;;  %v3434_v60 = vadd.f32 %v202_v34, %v198_v59 }
 0x157   :  { %v214_v49 = vpack.c.bf16 %v3434_v60, %v3432_v48 }
 0x159   :  { %2820 = vmatmul.mubr.msk.bf16.gmra.mrb[4].mxu0 %vm81_vm0, %v214_v49  ;;  %v2668_v49 = vld [vmem:[%s4043_s2 + $0x1] ss:$0 sm:$0xff] }
 0x15a   :  { %2837 = vmatprep.mubr.msk.bf16.mxu0 %vm3197_vm1, %v3196_v61 }
 0x224   :  { %v2817_v63 = vpop.f32.mrb[0].mxu0 }
 0x225   :  { %v284_v0 = vpop.f32.mrb[1].mxu0  ;;  %v293_v6 = vadd.f32 %v2817_v63, %v2652_v62 }
 0x226   :  { %v285_v1 = vadd.f32 %v2652_v62, %v284_v0  ;;  %v2818_v2 = vpop.f32.mrb[2].mxu0 }
 0x227   :  { %v287_v3 = vpop.f32.mrb[3].mxu0  ;;  %v3454_v10 = vpack.c.bf16 %v293_v6, %v293_v6  ;;  %v296_v11 = vadd.f32 %v2818_v2, %v2652_v62 }
 0x228   :  { %v3448_v4 = vpack.c.bf16 %v285_v1, %v285_v1  ;;  %v288_v5 = vadd.f32 %v2652_v62, %v287_v3 }
 0x229   :  { %v3459_v18 = vpack.c.bf16 %v296_v11, %v296_v11 }
 0x22a   :  { %v3450_v7 = vpack.c.bf16 %v288_v5, %v288_v5  ;;  %324 = vrot.lane.b32.xlu0 %v3448_v4, %s3198_s23 }
 0x22c   :  { %v2821_v8 = vpop.f32.mrb[4].mxu0  ;;  %373 = vrot.lane.b32.xlu1 %v3450_v7, %s3198_s23 }
 0x22d   :  { %v300_v9 = vpop.f32.mrb[5].mxu0  ;;  %v309_v16 = vadd.f32 %v2821_v8, %v2652_v62 }
 0x22e   :  { %v301_v12 = vadd.f32 %v2652_v62, %v300_v9  ;;  %v2822_v14 = vpop.f32.mrb[6].mxu0 }
 0x22f   :  { %v303_v15 = vpop.f32.mrb[7].mxu0  ;;  %v3462_v22 = vpack.c.bf16 %v309_v16, %v309_v16  ;;  %v312_v23 = vadd.f32 %v2822_v14, %v2652_v62  ;;  %v2671_v14 = vld [vmem:[%s4043_s2 + $0x4] ss:$0 sm:$0xff] }
 0x230   :  { %v3456_v17 = vpack.c.bf16 %v301_v12, %v301_v12  ;;  %422 = vrot.lane.b32.xlu1 %v3454_v10, %s3198_s23  ;;  %v304_v19 = vadd.f32 %v2652_v62, %v303_v15  ;;  %v2667_v62 = vld [vmem:[%s4043_s2] ss:$0 sm:$0xff] }
 0x231   :  { %v3469_v26 = vpack.c.bf16 %v312_v23, %v312_v23 }
 0x232   :  { %520 = vrot.lane.b32.xlu0 %v3456_v17, %s3198_s23  ;;  %v3465_v24 = vpack.c.bf16 %v304_v19, %v304_v19 }
 0x234   :  { %471 = vrot.lane.b32.xlu1 %v3459_v18, %s3198_s23 }
 0x236   :  { %618 = vrot.lane.b32.xlu0 %v3462_v22, %s3198_s23 }
 0x238   :  { %569 = vrot.lane.b32.xlu1 %v3465_v24, %s3198_s23 }
 0x23c   :  { %667 = vrot.lane.b32.xlu1 %v3469_v26, %s3198_s23 }
 0x29c   :  { %v325_v27 = vpop.permute.xlu0 %324 }
 0x29d   :  { %v330_v30 = vsel %vm81_vm0, %v325_v27, 0 }
 0x29e   :  { %v374_v31 = vpop.permute.xlu1 %373  ;;  %2824 = vmatpush3.bf16.xpose.msra.mxu1 %v330_v30  ;;  %v2670_v30 = vld [vmem:[%s4043_s2 + $0x3] ss:$0 sm:$0xff] }
 0x29f   :  { %2829 = vmatprep.subr.bf16.mxu1 %v3196_v61  ;;  %v379_v34 = vsel %vm81_vm0, %v374_v31, 0 }
 0x2a2   :  { %v423_v32 = vpop.permute.xlu1 %422 }
 0x2a3   :  { %v428_v33 = vsel %vm81_vm0, %v423_v32, 0 }
 0x2a4   :  { %2836 = vmatpush3.bf16.xpose.msra.mxu0 %v428_v33  ;;  %v521_v35 = vpop.permute.xlu0 %520 }
 0x2a5   :  { %2826 = vmatmul.mubr.msk.bf16.vlgmr.msra.gmra.mrb[0].mxu1 %vm81_vm0, %v3448_v4  ;;  %2847 = vmatprep.subr.bf16.mxu0 %v3196_v61  ;;  %v526_v20 = vsel %vm81_vm0, %v521_v35, 0 }
 0x2a6   :  { %2830 = vmatpush3.bf16.xpose.msra.mxu1 %v379_v34  ;;  %2831 = vmatprep.mubr.msk.bf16.mxu1 %vm3197_vm1, %v3196_v61  ;;  %v472_v36 = vpop.permute.xlu1 %471 }
 0x2a7   :  { %2841 = vmatprep.subr.bf16.mxu1 %v3196_v61  ;;  %v477_v37 = vsel %vm81_vm0, %v472_v36, 0 }
 0x2a8   :  { %v619_v40 = vpop.permute.xlu0 %618 }
 0x2a9   :  { %v624_v44 = vsel %vm81_vm0, %v619_v40, 0 }
 0x2aa   :  { %v570_v43 = vpop.permute.xlu1 %569 }
 0x2ab   :  { %2838 = vmatmul.mubr.msk.bf16.vlgmr.msra.gmra.mrb[8].mxu0 %vm81_vm0, %v3454_v10  ;;  %v575_v28 = vsel %vm81_vm0, %v570_v43, 0  ;;  %v2673_v43 = vld [vmem:[%s4043_s2 + $0x6] ss:$0 sm:$0xff] }
 0x2ac   :  { %2848 = vmatpush3.bf16.xpose.msra.mxu0 %v526_v20  ;;  %2849 = vmatprep.mubr.msk.bf16.mxu0 %vm3197_vm1, %v3196_v61 }
 0x2ad   :  { %2832 = vmatmul.mubr.msk.bf16.vlgmr.msra.gmra.mrb[4].mxu1 %vm81_vm0, %v3450_v7  ;;  %2859 = vmatprep.subr.bf16.mxu0 %v3196_v61 }
 0x2ae   :  { %2842 = vmatpush3.bf16.xpose.msra.mxu1 %v477_v37  ;;  %2843 = vmatprep.mubr.msk.bf16.mxu1 %vm3197_vm1, %v3196_v61  ;;  %v668_v45 = vpop.permute.xlu1 %667 }
 0x2af   :  { %2853 = vmatprep.subr.bf16.mxu1 %v3196_v61  ;;  %v673_v46 = vsel %vm81_vm0, %v668_v45, 0 }
 0x2b3   :  { %2850 = vmatmul.mubr.msk.bf16.vlgmr.msra.gmra.mrb[12].mxu0 %vm81_vm0, %v3456_v17 }
 0x2b4   :  { %2860 = vmatpush3.bf16.xpose.msra.mxu0 %v624_v44  ;;  %2861 = vmatprep.mubr.msk.bf16.mxu0 %vm3197_vm1, %v3196_v61 }
 0x2b5   :  { %2844 = vmatmul.mubr.msk.bf16.vlgmr.msra.gmra.mrb[8].mxu1 %vm81_vm0, %v3459_v18  ;;  %2871 = vmatprep.subr.bf16.mxu0 %v3196_v61 }
 0x2b6   :  { %2854 = vmatpush3.bf16.xpose.msra.mxu1 %v575_v28  ;;  %2855 = vmatprep.mubr.msk.bf16.mxu1 %vm3197_vm1, %v3196_v61 }
 0x2b7   :  { %2865 = vmatprep.subr.bf16.mxu1 %v3196_v61 }
 0x2bb   :  { %2862 = vmatmul.mubr.msk.bf16.vlgmr.msra.gmra.mrb[16].mxu0 %vm81_vm0, %v3462_v22 }
 0x2bc   :  { %2873 = vmatprep.mubr.msk.bf16.mxu0 %vm3197_vm1, %v3196_v61 }
 0x2bd   :  { %2856 = vmatmul.mubr.msk.bf16.vlgmr.msra.gmra.mrb[12].mxu1 %vm81_vm0, %v3465_v24 }
 0x2be   :  { %2866 = vmatpush3.bf16.xpose.msra.mxu1 %v673_v46  ;;  %2867 = vmatprep.mubr.msk.bf16.mxu1 %vm3197_vm1, %v3196_v61 }
 0x2bf   :  { %2877 = vmatprep.subr.bf16.mxu1 %v3196_v61 }
 0x2c5   :  { %2868 = vmatmul.mubr.msk.bf16.vlgmr.msra.gmra.mrb[16].mxu1 %vm81_vm0, %v3469_v26 }
 0x2c6   :  { %2879 = vmatprep.mubr.msk.bf16.mxu1 %vm3197_vm1, %v3196_v61 }
 0x378   :  { %v366_v47 = vpop.f32.mrb[0].mxu1 }
 0x379   :  { %v2827_v21 = vpop.f32.mrb[1].mxu1  ;;  %v715_v54 = vmul.f32 0.17677669, %v366_v47 }
 0x37a   :  { %v369_v51 = vpop.f32.mrb[2].mxu1 }
 0x37b   :  { %v2828_v52 = vpop.f32.mrb[3].mxu1  ;;  %v3535_v9 = vadd.f32 %v2667_v62, %v715_v54  ;;  %v2672_v62 = vld [vmem:[%s4043_s2 + $0x5] ss:$0 sm:$0xff] }
 0x37d   :  { %v788_v19 = vsel %vm787_vm2, %v3535_v9, -inf }
 0x37e   :  { %v464_v38 = vpop.f32.mrb[8].mxu0 }
 0x37f   :  { %v717_v55 = vmul.f32 0.17677669, %v464_v38  ;;  %v2839_v57 = vpop.f32.mrb[9].mxu0 }
 0x380   :  { %v415_v58 = vpop.f32.mrb[4].mxu1  ;;  %v467_v59 = vpop.f32.mrb[10].mxu0 }
 0x381   :  { %v716_v63 = vmul.f32 0.17677669, %v415_v58  ;;  %v2833_v0 = vpop.f32.mrb[5].mxu1  ;;  %v2840_v1 = vpop.f32.mrb[11].mxu0  ;;  %v3529_v2 = vadd.f32 %v2669_v53, %v717_v55 }
 0x382   :  { %v418_v3 = vpop.f32.mrb[6].mxu1 }
 0x383   :  { %v2834_v5 = vpop.f32.mrb[7].mxu1  ;;  %v794_v6 = vsel %vm787_vm2, %v3529_v2, -inf  ;;  %v3533_v8 = vadd.f32 %v2668_v49, %v716_v63 }
 0x384   :  { %795 = vmax.xlane.f32.xlu0 %v794_v6 }
 0x385   :  { %v791_v11 = vsel %vm787_vm2, %v3533_v8, -inf }
 0x386   :  { %792 = vmax.xlane.f32.xlu1 %v791_v11  ;;  %v562_v12 = vpop.f32.mrb[12].mxu0 }
 0x387   :  { %v719_v15 = vmul.f32 0.17677669, %v562_v12  ;;  %v2851_v16 = vpop.f32.mrb[13].mxu0 }
 0x388   :  { %789 = vmax.xlane.f32.xlu0 %v788_v19  ;;  %v513_v23 = vpop.f32.mrb[8].mxu1  ;;  %v565_v27 = vpop.f32.mrb[14].mxu0 }
 0x389   :  { %v718_v31 = vmul.f32 0.17677669, %v513_v23  ;;  %v2845_v32 = vpop.f32.mrb[9].mxu1  ;;  %v2852_v33 = vpop.f32.mrb[15].mxu0  ;;  %v3547_v34 = vadd.f32 %v2671_v14, %v719_v15 }
 0x38a   :  { %v516_v35 = vpop.f32.mrb[10].mxu1 }
 0x38b   :  { %v2846_v36 = vpop.f32.mrb[11].mxu1  ;;  %v800_v20 = vsel %vm787_vm2, %v3547_v34, -inf  ;;  %v3551_v37 = vadd.f32 %v2670_v30, %v718_v31 }
 0x38c   :  { %801 = vmax.xlane.f32.xlu0 %v800_v20 }
 0x38d   :  { %v797_v45 = vsel %vm787_vm2, %v3551_v37, -inf }
 0x38e   :  { %v660_v40 = vpop.f32.mrb[16].mxu0 }
 0x38f   :  { %v721_v44 = vmul.f32 0.17677669, %v660_v40  ;;  %v2863_v28 = vpop.f32.mrb[17].mxu0 }
 0x390   :  { %v611_v46 = vpop.f32.mrb[12].mxu1  ;;  %798 = vmax.xlane.f32.xlu0 %v797_v45  ;;  %v663_v47 = vpop.f32.mrb[18].mxu0 }
 0x391   :  { %v2857_v21 = vpop.f32.mrb[13].mxu1  ;;  %v2864_v51 = vpop.f32.mrb[19].mxu0  ;;  %v3558_v52 = vadd.f32 %v2673_v43, %v721_v44  ;;  %v720_v49 = vmul.f32 0.17677669, %v611_v46 }
 0x392   :  { %v614_v38 = vpop.f32.mrb[14].mxu1 }
 0x393   :  { %v2858_v53 = vpop.f32.mrb[15].mxu1  ;;  %v806_v54 = vsel %vm787_vm2, %v3558_v52, -inf  ;;  %v784_v0 = vadd.f32 %v2672_v62, %v720_v49 }
 0x394   :  { %807 = vmax.xlane.f32.xlu0 %v806_v54 }
 0x395   :  { %v803_v1 = vsel %vm787_vm2, %v784_v0, -inf }
 0x397   :  { %933 = vrot.lane.b32.xlu1 %v3450_v7, %s3199_s22  ;;  %v2674_v7 = vld [vmem:[%s4043_s2 + $0x7] ss:$0 sm:$0xff] }
 0x398   :  { %v709_v55 = vpop.f32.mrb[16].mxu1 }
 0x399   :  { %v2869_v57 = vpop.f32.mrb[17].mxu1  ;;  %v722_v63 = vmul.f32 0.17677669, %v709_v55 }
 0x39a   :  { %v712_v58 = vpop.f32.mrb[18].mxu1 }
 0x39b   :  { %981 = vrot.lane.b32.xlu1 %v3454_v10, %s3199_s22  ;;  %v2870_v59 = vpop.f32.mrb[19].mxu1  ;;  %v786_v3 = vadd.f32 %v2674_v7, %v722_v63 }
 0x39d   :  { %v809_v10 = vsel %vm787_vm2, %v786_v3, -inf }
 0x3aa   :  { %884 = vrot.lane.b32.xlu0 %v3448_v4, %s3199_s22 }
 0x3bf   :  { %804 = vmax.xlane.f32.xlu1 %v803_v1 }
 0x3c3   :  { %810 = vmax.xlane.f32.xlu1 %v809_v10 }
 0x3d4   :  { %1029 = vrot.lane.b32.xlu1 %v3459_v18, %s3199_s22 }
 0x411   :  { %v796_v4 = vpop.xlane.xlu0 %795 }
 0x412   :  { %v814_v5 = vsub.f32 %v3529_v2, %v796_v4 }
 0x413   :  { %v793_v6 = vpop.xlane.xlu1 %792 }
 0x414   :  { %v824_v11 = vmul.f32 1.442695, %v814_v5  ;;  %v813_v12 = vsub.f32 %v3533_v8, %v793_v6 }
 0x415   :  { %v790_v14 = vpop.xlane.xlu0 %789 }
 0x416   :  { %3086 = vpow2.f32 %v824_v11  ;;  %v822_v15 = vmul.f32 1.442695, %v813_v12  ;;  %v812_v16 = vsub.f32 %v3535_v9, %v790_v14 }
 0x417   :  { %v934_v19 = vpop.permute.xlu1 %933 }
 0x418   :  { %3088 = vpow2.f32 %v822_v15  ;;  %v820_v23 = vmul.f32 1.442695, %v812_v16  ;;  %v939_v27 = vsel %vm889_vm3, %v934_v19, 0 }
 0x419   :  { %2878 = vmatpush3.bf16.msra.mxu1 %v939_v27  ;;  %v802_v18 = vpop.xlane.xlu0 %801 }
 0x41a   :  { %3090 = vpow2.f32 %v820_v23  ;;  %2889 = vmatprep.subr.bf16.mxu1 %v3196_v61  ;;  %v816_v43 = vsub.f32 %v3547_v34, %v802_v18 }
 0x41b   :  { %v982_v28 = vpop.permute.xlu1 %981 }
 0x41c   :  { %v828_v46 = vmul.f32 1.442695, %v816_v43 }
 0x41d   :  { %v799_v2 = vpop.xlane.xlu0 %798 }
 0x41e   :  { %v815_v40 = vsub.f32 %v3551_v37, %v799_v2 }
 0x420   :  { %v3583_v30 = vpop.eup %3086  ;;  %v826_v44 = vmul.f32 1.442695, %v815_v40 }
 0x421   :  { %v808_v8 = vpop.xlane.xlu0 %807  ;;  %v842_v31 = vsel %vm787_vm2, %v3583_v30, 0.0 }
 0x422   :  { %v3089_v32 = vpop.eup %3088  ;;  %843 = vadd.xlane.f32.xlu0 %v842_v31  ;;  %v818_v45 = vsub.f32 %v3558_v52, %v808_v8  ;;  %3092 = vpow2.f32 %v826_v44 }
 0x423   :  { %v839_v9 = vsel %vm787_vm2, %v3089_v32, 0.0  ;;  %3094 = vpow2.f32 %v828_v46 }
 0x424   :  { %v3091_v33 = vpop.eup %3090  ;;  %840 = vadd.xlane.f32.xlu1 %v839_v9  ;;  %v832_v47 = vmul.f32 1.442695, %v818_v45 }
 0x425   :  { %v885_v35 = vpop.permute.xlu0 %884  ;;  %v836_v36 = vsel %vm787_vm2, %v3091_v33, 0.0 }
 0x426   :  { %v891_v20 = vsel %vm889_vm3, %v885_v35, 0  ;;  %837 = vadd.xlane.f32.xlu0 %v836_v36  ;;  %3096 = vpow2.f32 %v832_v47 }
 0x427   :  { %2872 = vmatpush3.bf16.msra.mxu0 %v891_v20 }
 0x428   :  { %2883 = vmatprep.subr.bf16.mxu0 %v3196_v61 }
 0x42c   :  { %v3093_v54 = vpop.eup %3092 }
 0x42d   :  { %v3095_v37 = vpop.eup %3094  ;;  %v845_v34 = vsel %vm787_vm2, %v3093_v54, 0.0 }
 0x42e   :  { %v848_v52 = vsel %vm787_vm2, %v3095_v37, 0.0 }
 0x430   :  { %v3599_v55 = vpop.eup %3096 }
 0x431   :  { %v854_v59 = vsel %vm787_vm2, %v3599_v55, 0.0 }
 0x435   :  { %1125 = vrot.lane.b32.xlu1 %v3465_v24, %s3199_s22 }
 0x43c   :  { %1077 = vrot.lane.b32.xlu0 %v3456_v17, %s3199_s22 }
 0x44c   :  { %v805_v21 = vpop.xlane.xlu1 %804 }
 0x44d   :  { %v817_v51 = vsub.f32 %v784_v0, %v805_v21 }
 0x44f   :  { %v830_v38 = vmul.f32 1.442695, %v817_v51 }
 0x450   :  { %v811_v24 = vpop.xlane.xlu1 %810 }
 0x451   :  { %3098 = vpow2.f32 %v830_v38  ;;  %v819_v53 = vsub.f32 %v786_v3, %v811_v24 }
 0x453   :  { %v834_v17 = vmul.f32 1.442695, %v819_v53 }
 0x454   :  { %v1030_v63 = vpop.permute.xlu1 %1029 }
 0x455   :  { %3100 = vpow2.f32 %v834_v17  ;;  %v1035_v11 = vsel %vm889_vm3, %v1030_v63, 0 }
 0x459   :  { %846 = vadd.xlane.f32.xlu1 %v845_v34 }
 0x45b   :  { %v3602_v57 = vpop.eup %3098  ;;  %849 = vadd.xlane.f32.xlu0 %v848_v52 }
 0x45c   :  { %v851_v58 = vsel %vm787_vm2, %v3602_v57, 0.0 }
 0x45d   :  { %852 = vadd.xlane.f32.xlu1 %v851_v58 }
 0x45f   :  { %v3608_v49 = vpop.eup %3100  ;;  %855 = vadd.xlane.f32.xlu0 %v854_v59 }
 0x460   :  { %v857_v62 = vsel %vm787_vm2, %v3608_v49, 0.0 }
 0x461   :  { %858 = vadd.xlane.f32.xlu1 %v857_v62 }
 0x472   :  { %1221 = vrot.lane.b32.xlu1 %v3469_v26, %s3199_s22 }
 0x475   :  { %1173 = vrot.lane.b32.xlu0 %v3462_v22, %s3199_s22  ;;  %v987_v22 = vsel %vm889_vm3, %v982_v28, 0 }
 0x4af   :  { %v844_v0 = vpop.xlane.xlu0 %843 }
 0x4b1   :  { %v841_v7 = vpop.xlane.xlu1 %840 }
 0x4b2   :  { %3102 = vrcp.f32 %v841_v7 }
 0x4b3   :  { %v838_v1 = vpop.xlane.xlu0 %837 }
 0x4b4   :  { %3104 = vrcp.f32 %v838_v1 }
 0x4b5   :  { %3106 = vrcp.f32 %v844_v0  ;;  %v1126_v23 = vpop.permute.xlu1 %1125 }
 0x4b6   :  { %v1131_v40 = vsel %vm889_vm3, %v1126_v23, 0 }
 0x4b7   :  { %v1078_v15 = vpop.permute.xlu0 %1077 }
 0x4b8   :  { %v1083_v19 = vsel %vm889_vm3, %v1078_v15, 0 }
 0x4bc   :  { %v3103_v3 = vpop.eup %3102 }
 0x4bd   :  { %v869_v10 = vmul.f32 %v3103_v3, %v3089_v32 }
 0x4be   :  { %v3105_v4 = vpop.eup %3104 }
 0x4bf   :  { %v868_v5 = vmul.f32 %v3105_v4, %v3091_v33  ;;  %v877_v6 = vpack.c.bf16 %v869_v10, %v869_v10  ;;  %v3107_v12 = vpop.eup %3106 }
 0x4c0   :  { %v870_v14 = vmul.f32 %v3107_v12, %v3583_v30 }
 0x4c1   :  { %2880 = vmatmul.mubr.msk.bf16.vlgmr.msra.gmra.mrb[20].mxu1 %vm787_vm2, %v877_v6  ;;  %v876_v26 = vpack.c.bf16 %v868_v5, %v868_v5 }
 0x4c2   :  { %2890 = vmatpush3.bf16.msra.mxu1 %v1035_v11  ;;  %2891 = vmatprep.mubr.msk.bf16.mxu1 %vm3197_vm1, %v3196_v61  ;;  %v878_v16 = vpack.c.bf16 %v870_v14, %v870_v14 }
 0x4c3   :  { %2874 = vmatmul.mubr.msk.bf16.vlgmr.msra.gmra.mrb[20].mxu0 %vm787_vm2, %v876_v26  ;;  %2901 = vmatprep.subr.bf16.mxu1 %v3196_v61 }
 0x4c4   :  { %2884 = vmatpush3.bf16.msra.mxu0 %v987_v22  ;;  %2885 = vmatprep.mubr.msk.bf16.mxu0 %vm3197_vm1, %v3196_v61 }
 0x4c5   :  { %2895 = vmatprep.subr.bf16.mxu0 %v3196_v61 }
 0x4cb   :  { %2886 = vmatmul.mubr.msk.bf16.vlgmr.msra.gmra.mrb[24].mxu0 %vm787_vm2, %v878_v16 }
 0x4cc   :  { %2896 = vmatpush3.bf16.msra.mxu0 %v1083_v19  ;;  %2897 = vmatprep.mubr.msk.bf16.mxu0 %vm3197_vm1, %v3196_v61 }
 0x4cd   :  { %2907 = vmatprep.subr.bf16.mxu0 %v3196_v61 }
 0x4e6   :  { %v847_v27 = vpop.xlane.xlu1 %846 }
 0x4e7   :  { %3108 = vrcp.f32 %v847_v27 }
 0x4e8   :  { %v850_v18 = vpop.xlane.xlu0 %849 }
 0x4e9   :  { %3110 = vrcp.f32 %v850_v18 }
 0x4ea   :  { %v853_v2 = vpop.xlane.xlu1 %852 }
 0x4eb   :  { %3112 = vrcp.f32 %v853_v2 }
 0x4ec   :  { %v856_v30 = vpop.xlane.xlu0 %855 }
 0x4ed   :  { %3114 = vrcp.f32 %v856_v30 }
 0x4ee   :  { %v859_v8 = vpop.xlane.xlu1 %858 }
 0x4ef   :  { %3116 = vrcp.f32 %v859_v8 }
 0x4f0   :  { %v1174_v20 = vpop.permute.xlu0 %1173 }
 0x4f1   :  { %v3109_v31 = vpop.eup %3108  ;;  %v1179_v45 = vsel %vm889_vm3, %v1174_v20, 0 }
 0x4f2   :  { %v871_v32 = vmul.f32 %v3109_v31, %v3093_v54  ;;  %v1222_v47 = vpop.permute.xlu1 %1221  ;;  %v3053_v54 = vld [vmem:[%s4044_s27] sm:$0xff]  }
 0x4f3   :  { %v3111_v9 = vpop.eup %3110  ;;  %v1227_v38 = vsel %vm889_vm3, %v1222_v47, 0 }
 0x4f4   :  { %v872_v33 = vmul.f32 %v3111_v9, %v3095_v37  ;;  %v879_v35 = vpack.c.bf16 %v871_v32, %v871_v32  ;;  %v3054_v37 = vld [vmem:[%s4044_s27 + $0x8] sm:$0xff]  }
 0x4f5   :  { %v3113_v36 = vpop.eup %3112 }
 0x4f6   :  { %2892 = vmatmul.mubr.msk.bf16.vlgmr.msra.gmra.mrb[24].mxu1 %vm787_vm2, %v879_v35  ;;  %v880_v43 = vpack.c.bf16 %v872_v33, %v872_v33  ;;  %v873_v28 = vmul.f32 %v3113_v36, %v3602_v57  ;;  %v2683_v36 = vld [vmem:[%s4014_s6] ss:$0 sm:$0xff] }
 0x4f7   :  { %v3115_v44 = vpop.eup %3114  ;;  %2902 = vmatpush3.bf16.msra.mxu1 %v1131_v40  ;;  %2903 = vmatprep.mubr.msk.bf16.mxu1 %vm3197_vm1, %v3196_v61 }
 0x4f8   :  { %2898 = vmatmul.mubr.msk.bf16.vlgmr.msra.gmra.mrb[28].mxu0 %vm787_vm2, %v880_v43  ;;  %2913 = vmatprep.subr.bf16.mxu1 %v3196_v61  ;;  %v874_v46 = vmul.f32 %v3115_v44, %v3599_v55  ;;  %v881_v21 = vpack.c.bf16 %v873_v28, %v873_v28 }
 0x4f9   :  { %2908 = vmatpush3.bf16.msra.mxu0 %v1179_v45  ;;  %2909 = vmatprep.mubr.msk.bf16.mxu0 %vm3197_vm1, %v3196_v61  ;;  %v3117_v51 = vpop.eup %3116 }
 0x4fa   :  { %v882_v24 = vpack.c.bf16 %v874_v46, %v874_v46  ;;  %v875_v53 = vmul.f32 %v3117_v51, %v3608_v49  ;;  %2919 = vmatprep.subr.bf16.mxu0 %v3053_v54 }
 0x4fc   :  { %v883_v17 = vpack.c.bf16 %v875_v53, %v875_v53 }
 0x4fe   :  { %2904 = vmatmul.mubr.msk.bf16.vlgmr.msra.gmra.mrb[28].mxu1 %vm787_vm2, %v881_v21 }
 0x4ff   :  { %2914 = vmatpush3.bf16.msra.mxu1 %v1227_v38  ;;  %2915 = vmatprep.mubr.msk.bf16.mxu1 %vm3197_vm1, %v3196_v61 }
 0x500   :  { %2910 = vmatmul.mubr.msk.bf16.vlgmr.msra.gmra.mrb[32].mxu0 %vm787_vm2, %v882_v24  ;;  %2931 = vmatprep.subr.bf16.mxu1 %v3196_v61 }
 0x501   :  { %2920 = vmatpush3.bf16.msra.mxu0 %v3053_v54 }
 0x502   :  { %2921 = vmatprep.subr.bf16.mxu0 %v3054_v37 }
 0x505   :  { %2922 = vmatpush3.bf16.msra.mxu0 %v3054_v37 }
 0x506   :  { %2916 = vmatmul.mubr.msk.bf16.vlgmr.msra.gmra.mrb[32].mxu1 %vm787_vm2, %v883_v17  ;;  %2939 = vmatprep.subr.bf16.mxu0 %v3196_v61 }
 0x507   :  { %2935 = vmatprep.mubr.msk.bf16.mxu1 %vm3197_vm1, %v3196_v61 }
 0x594   :  { %v975_v34 = vpop.f32.mrb[20].mxu1 }
 0x595   :  { %v2881_v55 = vpop.f32.mrb[21].mxu1 }
 0x596   :  { %v927_v52 = vpop.f32.mrb[20].mxu0  ;;  %v978_v57 = vpop.f32.mrb[22].mxu1 }
 0x597   :  { %v1269_v58 = vpack.c.bf16 %v975_v34, %v927_v52  ;;  %v2875_v59 = vpop.f32.mrb[21].mxu0  ;;  %v2882_v49 = vpop.f32.mrb[23].mxu1 }
 0x598   :  { %v930_v62 = vpop.f32.mrb[22].mxu0 }
 0x599   :  { %v2876_v63 = vpop.f32.mrb[23].mxu0  ;;  %2923 = vmatprep.mubr.msk.bf16.mxu0 %vm81_vm0, %v1269_v58 }
 0x59e   :  { %v1023_v0 = vpop.f32.mrb[24].mxu0 }
 0x59f   :  { %v2887_v7 = vpop.f32.mrb[25].mxu0 }
 0x5a0   :  { %v1026_v1 = vpop.f32.mrb[26].mxu0 }
 0x5a1   :  { %v2888_v3 = vpop.f32.mrb[27].mxu0 }
 0x5c9   :  { %v1071_v10 = vpop.f32.mrb[24].mxu1 }
 0x5ca   :  { %v1270_v4 = vpack.c.bf16 %v1071_v10, %v1023_v0  ;;  %v2893_v5 = vpop.f32.mrb[25].mxu1 }
 0x5cb   :  { %v1074_v6 = vpop.f32.mrb[26].mxu1  ;;  %v1119_v11 = vpop.f32.mrb[28].mxu0 }
 0x5cc   :  { %v2894_v26 = vpop.f32.mrb[27].mxu1  ;;  %v2899_v12 = vpop.f32.mrb[29].mxu0  ;;  %2924 = vmatmul.mubr.msk.bf16.vlgmr.msra.gmra.mrb[36].mxu0 %vm81_vm0, %v1270_v4 }
 0x5cd   :  { %v1122_v22 = vpop.f32.mrb[30].mxu0 }
 0x5ce   :  { %v2900_v14 = vpop.f32.mrb[31].mxu0 }
 0x5d1   :  { %v1167_v15 = vpop.f32.mrb[28].mxu1 }
 0x5d2   :  { %v1271_v16 = vpack.c.bf16 %v1167_v15, %v1119_v11  ;;  %v2905_v19 = vpop.f32.mrb[29].mxu1 }
 0x5d3   :  { %v1170_v23 = vpop.f32.mrb[30].mxu1  ;;  %v1215_v27 = vpop.f32.mrb[32].mxu0 }
 0x5d4   :  { %v2906_v18 = vpop.f32.mrb[31].mxu1  ;;  %v2911_v2 = vpop.f32.mrb[33].mxu0  ;;  %2927 = vmatprep.mubr.msk.bf16.mxu0 %vm81_vm0, %v1271_v16 }
 0x5d5   :  { %v1218_v30 = vpop.f32.mrb[34].mxu0 }
 0x5d6   :  { %v2912_v8 = vpop.f32.mrb[35].mxu0 }
 0x5d9   :  { %v1263_v31 = vpop.f32.mrb[32].mxu1 }
 0x5da   :  { %v1272_v32 = vpack.c.bf16 %v1263_v31, %v1215_v27  ;;  %v2917_v9 = vpop.f32.mrb[33].mxu1 }
 0x5db   :  { %v1266_v33 = vpop.f32.mrb[34].mxu1 }
 0x5dc   :  { %v2918_v35 = vpop.f32.mrb[35].mxu1  ;;  %2928 = vmatmul.mubr.msk.bf16.gmra.mrb[40].mxu0 %vm81_vm0, %v1272_v32 }
 0x5dd   :  { %2947 = vmatprep.mubr.msk.bf16.mxu0 %vm3197_vm1, %v3196_v61 }
 0x69f   :  { %v2925_v20 = vpop.f32.mrb[36].mxu0 }
 0x6a0   :  { %v1351_v40 = vadd.f32 %v2925_v20, %v2683_v36  ;;  %v1342_v43 = vpop.f32.mrb[37].mxu0 }
 0x6a1   :  { %v1343_v44 = vadd.f32 %v2683_v36, %v1342_v43  ;;  %v2926_v28 = vpop.f32.mrb[38].mxu0 }
 0x6a2   :  { %v1354_v45 = vadd.f32 %v2926_v28, %v2683_v36  ;;  %v1345_v46 = vpop.f32.mrb[39].mxu0  ;;  %v1375_v47 = vadd.f32 %v1351_v40, %v3416_v50 }
 0x6a3   :  { %v1373_v21 = vadd.f32 %v1343_v44, %v3407_v41  ;;  %v1346_v38 = vadd.f32 %v2683_v36, %v1345_v46 }
 0x6a4   :  { %v1387_v51 = vsel %vm81_vm0, %v1375_v47, 0.0  ;;  %v1376_v53 = vadd.f32 %v1354_v45, %v3418_v29 }
 0x6a5   :  { %1388 = vadd.xlane.f32.xlu1 %v1387_v51  ;;  %v1381_v24 = vsel %vm81_vm0, %v1373_v21, 0.0  ;;  %v1374_v54 = vadd.f32 %v1346_v38, %v3409_v42 }
 0x6a6   :  { %1382 = vadd.xlane.f32.xlu0 %v1381_v24  ;;  %v1390_v17 = vsel %vm81_vm0, %v1376_v53, 0.0  ;;  %v3055_v24 = vld [vmem:[%s4016_s8] sm:$0xff]  }
 0x6a7   :  { %v1384_v37 = vsel %vm81_vm0, %v1374_v54, 0.0  ;;  %2932 = vmatpush3.bf16.msra.mxu1 %v3055_v24 }
 0x6a8   :  { %2933 = vmatprep.subr.bf16.mxu1 %v3196_v61 }
 0x6aa   :  { %1391 = vadd.xlane.f32.xlu0 %v1390_v17 }
 0x6ae   :  { %1385 = vadd.xlane.f32.xlu0 %v1384_v37 }
 0x6af   :  { %v2929_v50 = vpop.f32.mrb[40].mxu0 }
 0x6b0   :  { %v1358_v34 = vpop.f32.mrb[41].mxu0  ;;  %v1367_v41 = vadd.f32 %v2929_v50, %v2683_v36 }
 0x6b1   :  { %v1359_v55 = vadd.f32 %v2683_v36, %v1358_v34  ;;  %v2930_v52 = vpop.f32.mrb[42].mxu0 }
 0x6b2   :  { %v1361_v57 = vpop.f32.mrb[43].mxu0  ;;  %v1370_v58 = vadd.f32 %v2930_v52, %v2683_v36  ;;  %v1379_v42 = vadd.f32 %v1367_v41, %v3432_v48 }
 0x6b3   :  { %v1362_v59 = vadd.f32 %v2683_v36, %v1361_v57  ;;  %v1377_v49 = vadd.f32 %v1359_v55, %v3425_v56 }
 0x6b4   :  { %v1380_v0 = vadd.f32 %v1370_v58, %v3434_v60  ;;  %v1399_v7 = vsel %vm81_vm0, %v1379_v42, 0.0 }
 0x6b5   :  { %v1393_v29 = vsel %vm81_vm0, %v1377_v49, 0.0  ;;  %v1378_v62 = vadd.f32 %v1362_v59, %v3427_v39 }
 0x6b6   :  { %1394 = vadd.xlane.f32.xlu0 %v1393_v29  ;;  %v1402_v1 = vsel %vm81_vm0, %v1380_v0, 0.0  ;;  %v71_v29 = vld [vmem:[%s4015_s7 + $0x2] sm:$0x3] }
 0x6b7   :  { %v1396_v63 = vsel %vm81_vm0, %v1378_v62, 0.0 }
 0x6b8   :  { %1397 = vadd.xlane.f32.xlu1 %v1396_v63  ;;  %v3737_v63 = vrot.slane %v71_v29, %v3394_v13 }
 0x6ba   :  { %1400 = vadd.xlane.f32.xlu0 %v1399_v7 }
 0x6bc   :  { %1403 = vadd.xlane.f32.xlu1 %v1402_v1 }
 0x732   :  { %v1389_v3 = vpop.xlane.xlu1 %1388 }
 0x733   :  { %v1407_v56 = vmul.f32 0.03125, %v1389_v3  ;;  %v1383_v10 = vpop.xlane.xlu0 %1382 }
 0x734   :  { %v1405_v4 = vmul.f32 0.03125, %v1383_v10 }
 0x735   :  { %v3685_v5 = vsub.f32 %v1375_v47, %v1407_v56 }
 0x736   :  { %v3687_v39 = vsub.f32 %v1373_v21, %v1405_v4 }
 0x737   :  { %v1392_v48 = vpop.xlane.xlu0 %1391  ;;  %v1423_v6 = vmul.f32 %v3685_v5, %v3685_v5 }
 0x738   :  { %v1408_v60 = vmul.f32 0.03125, %v1392_v48  ;;  %v1421_v11 = vmul.f32 %v3687_v39, %v3687_v39 }
 0x739   :  { %v1435_v26 = vsel %vm81_vm0, %v1423_v6, 0.0  ;;  %v1500_v6 = vrot.slane %v71_v29, %v3401_v25 }
 0x73a   :  { %v3694_v12 = vsub.f32 %v1376_v53, %v1408_v60  ;;  %1436 = vadd.xlane.f32.xlu1 %v1435_v26  ;;  %v1429_v22 = vsel %vm81_vm0, %v1421_v11, 0.0  ;;  %v3056_v53 = vld [vmem:[%s4016_s8 + $0x8] sm:$0xff]   ;;  %s3205_s8 = smov [#allocation2]  }
 0x73b   :  { %1430 = vadd.xlane.f32.xlu0 %v1429_v22  ;;  %v1386_v14 = vpop.xlane.xlu0 %1385  ;;  %2934 = vmatpush3.bf16.msra.mxu1 %v3056_v53 }
 0x73c   :  { %v1406_v15 = vmul.f32 0.03125, %v1386_v14  ;;  %v1424_v16 = vmul.f32 %v3694_v12, %v3694_v12  ;;  %2951 = vmatprep.subr.bf16.mxu1 %v3196_v61 }
 0x73e   :  { %v3699_v19 = vsub.f32 %v1374_v54, %v1406_v15  ;;  %v1438_v23 = vsel %vm81_vm0, %v1424_v16, 0.0 }
 0x73f   :  { %1439 = vadd.xlane.f32.xlu1 %v1438_v23 }
 0x740   :  { %v1422_v27 = vmul.f32 %v3699_v19, %v3699_v19 }
 0x742   :  { %v1432_v18 = vsel %vm81_vm0, %v1422_v27, 0.0 }
 0x743   :  { %1433 = vadd.xlane.f32.xlu0 %v1432_v18  ;;  %v1395_v2 = vpop.xlane.xlu0 %1394 }
 0x744   :  { %v1409_v30 = vmul.f32 0.03125, %v1395_v2 }
 0x745   :  { %v1398_v8 = vpop.xlane.xlu1 %1397 }
 0x746   :  { %v3705_v31 = vsub.f32 %v1377_v49, %v1409_v30  ;;  %v1410_v32 = vmul.f32 0.03125, %v1398_v8 }
 0x747   :  { %v1401_v9 = vpop.xlane.xlu0 %1400 }
 0x748   :  { %v3707_v33 = vsub.f32 %v1378_v62, %v1410_v32  ;;  %v1411_v35 = vmul.f32 0.03125, %v1401_v9  ;;  %v1425_v36 = vmul.f32 %v3705_v31, %v3705_v31 }
 0x749   :  { %v1404_v20 = vpop.xlane.xlu1 %1403 }
 0x74a   :  { %v3711_v40 = vsub.f32 %v1379_v42, %v1411_v35  ;;  %v1412_v43 = vmul.f32 0.03125, %v1404_v20  ;;  %v1441_v44 = vsel %vm81_vm0, %v1425_v36, 0.0  ;;  %v1426_v28 = vmul.f32 %v3707_v33, %v3707_v33 }
 0x74b   :  { %1442 = vadd.xlane.f32.xlu0 %v1441_v44 }
 0x74c   :  { %v3716_v45 = vsub.f32 %v1380_v0, %v1412_v43  ;;  %v1444_v46 = vsel %vm81_vm0, %v1426_v28, 0.0  ;;  %v1427_v47 = vmul.f32 %v3711_v40, %v3711_v40 }
 0x74d   :  { %1445 = vadd.xlane.f32.xlu1 %v1444_v46 }
 0x74e   :  { %v1447_v21 = vsel %vm81_vm0, %v1427_v47, 0.0  ;;  %v1428_v51 = vmul.f32 %v3716_v45, %v3716_v45 }
 0x74f   :  { %1448 = vadd.xlane.f32.xlu0 %v1447_v21 }
 0x750   :  { %v1450_v38 = vsel %vm81_vm0, %v1428_v51, 0.0 }
 0x751   :  { %1451 = vadd.xlane.f32.xlu1 %v1450_v38 }
 0x7c7   :  { %v1437_v17 = vpop.xlane.xlu1 %1436 }
 0x7c8   :  { %v1455_v54 = vmul.f32 0.03125, %v1437_v17  ;;  %v1431_v37 = vpop.xlane.xlu0 %1430 }
 0x7c9   :  { %v1453_v50 = vmul.f32 0.03125, %v1431_v37 }
 0x7ca   :  { %v1463_v34 = vadd.f32 1e-12, %v1455_v54 }
 0x7cb   :  { %v1461_v41 = vadd.f32 1e-12, %v1453_v50 }
 0x7cc   :  { %3118 = vrsqrt.f32 %v1463_v34  ;;  %v1440_v55 = vpop.xlane.xlu1 %1439 }
 0x7cd   :  { %3120 = vrsqrt.f32 %v1461_v41  ;;  %v1456_v52 = vmul.f32 0.03125, %v1440_v55 }
 0x7cf   :  { %v1464_v57 = vadd.f32 1e-12, %v1456_v52 }
 0x7d0   :  { %v1434_v58 = vpop.xlane.xlu0 %1433 }
 0x7d1   :  { %3122 = vrsqrt.f32 %v1464_v57  ;;  %v1454_v59 = vmul.f32 0.03125, %v1434_v58 }
 0x7d3   :  { %v1462_v49 = vadd.f32 1e-12, %v1454_v59 }
 0x7d5   :  { %3124 = vrsqrt.f32 %v1462_v49 }
 0x7d6   :  { %v3119_v62 = vpop.eup %3118 }
 0x7d7   :  { %v3121_v42 = vpop.eup %3120  ;;  %v1479_v0 = vmul.f32 %v3119_v62, %v3685_v5 }
 0x7d8   :  { %v1443_v7 = vpop.xlane.xlu0 %1442  ;;  %v1477_v3 = vmul.f32 %v3121_v42, %v3687_v39 }
 0x7d9   :  { %v1457_v1 = vmul.f32 0.03125, %v1443_v7  ;;  %v1491_v60 = vmul.f32 %v3737_v63, %v1479_v0 }
 0x7da   :  { %v1446_v56 = vpop.xlane.xlu1 %1445  ;;  %v1489_v5 = vmul.f32 %v3737_v63, %v1477_v3 }
 0x7db   :  { %v3123_v10 = vpop.eup %3122  ;;  %v1465_v4 = vadd.f32 1e-12, %v1457_v1  ;;  %v1458_v48 = vmul.f32 0.03125, %v1446_v56  ;;  %v3746_v18 = vadd.f32 %v1500_v6, %v1491_v60 }
 0x7dc   :  { %v1449_v11 = vpop.xlane.xlu0 %1448  ;;  %v1480_v26 = vmul.f32 %v3123_v10, %v3694_v12  ;;  %v3749_v8 = vadd.f32 %v1500_v6, %v1489_v5  ;;  %v3058_v5 = vld [vmem:[%s4018_s10 + $0x8] sm:$0xff]  }
 0x7dd   :  { %3126 = vrsqrt.f32 %v1465_v4  ;;  %v1466_v22 = vadd.f32 1e-12, %v1458_v48  ;;  %v1459_v14 = vmul.f32 0.03125, %v1449_v11  ;;  %v1511_v9 = vpack.c.bf16 %v3746_v18, %v3746_v18 }
 0x7de   :  { %v1452_v15 = vpop.xlane.xlu1 %1451  ;;  %v1492_v2 = vmul.f32 %v3737_v63, %v1480_v26 }
 0x7df   :  { %v3125_v16 = vpop.eup %3124  ;;  %3128 = vrsqrt.f32 %v1466_v22  ;;  %v1467_v39 = vadd.f32 1e-12, %v1459_v14  ;;  %v1460_v23 = vmul.f32 0.03125, %v1452_v15  ;;  %v1538_v46 = vunpack.c.l.b16 %v1511_v9  ;;  %v3057_v14 = vld [vmem:[%s4018_s10] sm:$0xff]   ;;  %v3059_v15 = vld [vmem:[%s4018_s10 + $0x10] sm:$0xff]  }
 0x7e0   :  { %v1478_v27 = vmul.f32 %v3125_v16, %v3699_v19  ;;  %v3756_v35 = vadd.f32 %v1500_v6, %v1492_v2  ;;  %v1509_v19 = vpack.c.bf16 %v3749_v8, %v3749_v8  ;;  %2940 = vmatpush3.bf16.msra.mxu0 %v3057_v14  ;;  %v3060_v16 = vld [vmem:[%s4018_s10 + $0x18] sm:$0xff]  }
 0x7e1   :  { %3130 = vrsqrt.f32 %v1467_v39  ;;  %v1468_v30 = vadd.f32 1e-12, %v1460_v23  ;;  %v1547_v34 = vrot.slane %v1538_v46, 6  ;;  %2941 = vmatprep.subr.bf16.mxu0 %v3196_v61  ;;  %v2690_v39 = vld [vmem:[%s4017_s9] ss:$0 sm:$0xff] }
 0x7e2   :  { %v1490_v12 = vmul.f32 %v3737_v63, %v1478_v27  ;;  %v1512_v47 = vpack.c.bf16 %v3756_v35, %v3756_v35  ;;  %v1536_v21 = vunpack.c.l.b16 %v1509_v19 }
 0x7e3   :  { %3132 = vrsqrt.f32 %v1468_v30 }
 0x7e4   :  { %v3752_v32 = vadd.f32 %v1500_v6, %v1490_v12  ;;  %v1539_v41 = vunpack.c.l.b16 %v1512_v47  ;;  %2942 = vmatpush3.bf16.msra.mxu0 %v3058_v5 }
 0x7e5   :  { %2943 = vmatprep.subr.bf16.mxu0 %v3196_v61 }
 0x7e6   :  { %v1510_v36 = vpack.c.bf16 %v3752_v32, %v3752_v32  ;;  %v1550_v62 = vrot.slane %v1539_v41, 5 }
 0x7e7   :  { %v3127_v20 = vpop.eup %3126 }
 0x7e8   :  { %v1537_v43 = vunpack.c.l.b16 %v1510_v36  ;;  %v1481_v44 = vmul.f32 %v3127_v20, %v3705_v31  ;;  %2944 = vmatpush3.bf16.msra.mxu0 %v3059_v15 }
 0x7e9   :  { %v3129_v28 = vpop.eup %3128  ;;  %2945 = vmatprep.subr.bf16.mxu0 %v3196_v61 }
 0x7ea   :  { %v1544_v51 = vrot.slane %v1537_v43, 7  ;;  %v1493_v38 = vmul.f32 %v3737_v63, %v1481_v44  ;;  %v1482_v24 = vmul.f32 %v3129_v28, %v3707_v33 }
 0x7eb   :  { %v3131_v53 = vpop.eup %3130 }
 0x7ec   :  { %v1546_v17 = vsel %vm1545_vm4, %v1544_v51, %v1536_v21  ;;  %v3768_v54 = vadd.f32 %v1500_v6, %v1493_v38  ;;  %v1494_v31 = vmul.f32 %v3737_v63, %v1482_v24  ;;  %v1483_v37 = vmul.f32 %v3131_v53, %v3711_v40  ;;  %2946 = vmatpush3.bf16.msra.mxu0 %v3060_v16  ;;  %v2694_v51 = vld [vmem:[%s4019_s11] ss:$0 sm:$0xff] }
 0x7ed   :  { %v3133_v50 = vpop.eup %3132  ;;  %v1549_v58 = vsel %vm1548_vm5, %v1547_v34, %v1546_v17  ;;  %2967 = vmatprep.subr.bf16.mxu0 %v3196_v61 }
 0x7ee   :  { %v1513_v55 = vpack.c.bf16 %v3768_v54, %v3768_v54  ;;  %v3774_v52 = vadd.f32 %v1500_v6, %v1494_v31  ;;  %v1495_v33 = vmul.f32 %v3737_v63, %v1483_v37  ;;  %v1484_v57 = vmul.f32 %v3133_v50, %v3716_v45 }
 0x7ef   :  { %v1552_v45 = vsel %vm1551_vm6, %v1550_v62, %v1549_v58 }
 0x7f0   :  { %v1540_v59 = vunpack.c.l.b16 %v1513_v55  ;;  %v1514_v49 = vpack.c.bf16 %v3774_v52, %v3774_v52  ;;  %v3781_v40 = vadd.f32 %v1500_v6, %v1495_v33  ;;  %v1496_v29 = vmul.f32 %v3737_v63, %v1484_v57 }
 0x7f2   :  { %v1553_v42 = vrot.slane %v1540_v59, 4  ;;  %v1541_v0 = vunpack.c.l.b16 %v1514_v49  ;;  %v1515_v7 = vpack.c.bf16 %v3781_v40, %v3781_v40  ;;  %v3786_v1 = vadd.f32 %v1500_v6, %v1496_v29 }
 0x7f4   :  { %v1556_v3 = vrot.slane %v1541_v0, 3  ;;  %v1542_v56 = vunpack.c.l.b16 %v1515_v7  ;;  %v1516_v10 = vpack.c.bf16 %v3786_v1, %v3786_v1  ;;  %v1555_v4 = vsel %vm1554_vm7, %v1553_v42, %v1552_v45 }
 0x7f6   :  { %v1543_v63 = vunpack.c.l.b16 %v1516_v10  ;;  %v1558_v48 = vsel %vm1557_vm8, %v1556_v3, %v1555_v4  ;;  %v1559_v60 = vrot.slane %v1542_v56, 2 }
 0x7f8   :  { %v1561_v11 = vsel %vm1560_vm9, %v1559_v60, %v1558_v48  ;;  %v1562_v6 = vrot.slane %v1543_v63, 1 }
 0x7fa   :  { %v1564_v26 = vsel %vm1563_vm10, %v1562_v6, %v1561_v11 }
 0x7fb   :  { %v1565_v22 = vpack.c.b16 %v1564_v26, %v1564_v26 }
 0x7fd   :  { %2936 = vmatmul.mubr.msk.bf16.vlgmr.msra.gmra.mrb[36].mxu1 %vm81_vm0, %v1565_v22 }
 0x7fe   :  { %2955 = vmatprep.mubr.msk.bf16.mxu1 %vm3197_vm1, %v3196_v61 }
 0x8d0   :  { %v1615_v23 = vpop.f32.mrb[36].mxu1 }
 0x8d1   :  { %v1616_v27 = vadd.f32 %v2690_v39, %v1615_v23  ;;  %v2937_v2 = vpop.f32.mrb[37].mxu1 }
 0x8d2   :  { %v1618_v30 = vpop.f32.mrb[38].mxu1 }
 0x8d3   :  { %v1621_v12 = vmul.f32 %v1616_v27, %v1616_v27  ;;  %v2938_v9 = vpop.f32.mrb[39].mxu1 }
 0x8d5   :  { %v1622_v19 = vmul.f32 %v1621_v12, %v1616_v27 }
 0x8d7   :  { %v1623_v36 = vmul.f32 0.044715, %v1622_v19 }
 0x8d9   :  { %v1624_v20 = vadd.f32 %v1623_v36, %v1616_v27 }
 0x8db   :  { %v1625_v43 = vmul.f32 0.7978846, %v1624_v20 }
 0x8dd   :  { %3134 = vtanh.f32 %v1625_v43 }
 0x8e7   :  { %v3135_v44 = vpop.eup %3134 }
 0x8e8   :  { %v1627_v28 = vadd.f32 1.0, %v3135_v44 }
 0x8ea   :  { %v1628_v46 = vmul.f32 0.5, %v1627_v28 }
 0x8ec   :  { %v1629_v47 = vmul.f32 %v1628_v46, %v1616_v27 }
 0x8ee   :  { %v1630_v21 = vpack.c.bf16 %v1629_v47, %v1629_v47 }
 0x8f0   :  { %2948 = vmatmul.mubr.msk.bf16.vlgmr.msra.gmra.mrb[44].mxu0 %vm1670_vm11, %v1630_v21 }
 0x8f1   :  { %2971 = vmatprep.mubr.msk.bf16.mxu0 %vm3197_vm1, %v3196_v61 }
 0x9c3   :  { %v1708_v38 = vpop.f32.mrb[44].mxu0 }
 0x9c4   :  { %v1709_v24 = vadd.f32 %v2694_v51, %v1708_v38  ;;  %v2949_v53 = vpop.f32.mrb[45].mxu0 }
 0x9c5   :  { %v1711_v17 = vpop.f32.mrb[46].mxu0 }
 0x9c6   :  { %v2950_v31 = vpop.f32.mrb[47].mxu0  ;;  %v1715_v37 = vrot.slane %v1709_v24, 1  ;;  %v1716_v50 = vrot.slane %v1709_v24, 2  ;;  %v1717_v34 = vrot.slane %v1709_v24, 3  ;;  %v1718_v41 = vrot.slane %v1709_v24, 4 }
 0x9c7   :  { %v1719_v55 = vrot.slane %v1709_v24, 5  ;;  %v1720_v33 = vrot.slane %v1709_v24, 6  ;;  %v1721_v57 = vrot.slane %v1709_v24, 7  ;;  %v1730_v62 = vadd.f32 %v1709_v24, %v3749_v8 }
 0x9c8   :  { %v1731_v58 = vadd.f32 %v1715_v37, %v3752_v32  ;;  %v1732_v59 = vadd.f32 %v1716_v50, %v3746_v18  ;;  %v1733_v49 = vadd.f32 %v1717_v34, %v3756_v35  ;;  %v1734_v29 = vadd.f32 %v1718_v41, %v3768_v54 }
 0x9c9   :  { %v1735_v42 = vadd.f32 %v1719_v55, %v3774_v52  ;;  %v1736_v45 = vadd.f32 %v1720_v33, %v3781_v40  ;;  %v1737_v3 = vadd.f32 %v1721_v57, %v3786_v1 }
 0x9ca   :  { %v1746_v0 = vrot.slane %v1731_v58, 7  ;;  %v1748_v7 = vrot.slane %v1732_v59, 6  ;;  %v1750_v10 = vrot.slane %v1733_v49, 5  ;;  %v1752_v18 = vrot.slane %v1734_v29, 4 }
 0x9cb   :  { %v1754_v4 = vrot.slane %v1735_v42, 3  ;;  %v1756_v8 = vrot.slane %v1736_v45, 2  ;;  %v1758_v63 = vrot.slane %v1737_v3, 1 }
 0x9cc   :  { %v1747_v56 = vsel %vm1545_vm4, %v1746_v0, %v1730_v62 }
 0x9cd   :  { %v1749_v32 = vsel %vm1548_vm5, %v1748_v7, %v1747_v56  ;;  %v72_v7 = vld [vmem:[%s4015_s7 + $0x4] sm:$0x3]  ;;  %s2644_s7 = sshll.u32 %s3205_s8, 4  ;;  %s2645_s7 = int_to_ptr.vmem [resolvable:$true] %s2644_s7 }
 0x9ce   :  { %v1751_v35 = vsel %vm1551_vm6, %v1750_v10, %v1749_v32  ;;  %v1865_v56 = vrot.slane %v72_v7, %v3401_v25  ;;  %p3177_p1 = scmp.lt.s32.totalorder %s2645_s7, %s2645_s7 }
 0x9cf   :  { %v1753_v54 = vsel %vm1554_vm7, %v1752_v18, %v1751_v35 }
 0x9d0   :  { %v1755_v52 = vsel %vm1557_vm8, %v1754_v4, %v1753_v54 }
 0x9d1   :  { %v1757_v48 = vsel %vm1560_vm9, %v1756_v8, %v1755_v52 }
 0x9d2   :  { %v1759_v40 = vsel %vm1563_vm10, %v1758_v63, %v1757_v48 }
 0x9d3   :  { %v1761_v1 = vsel %vm81_vm0, %v1759_v40, 0.0 }
 0x9d4   :  { %1762 = vadd.xlane.f32.xlu0 %v1761_v1 }
 0xa61   :  { %v1763_v60 = vpop.xlane.xlu0 %1762 }
 0xa62   :  { %v1764_v11 = vmul.f32 0.03125, %v1763_v60 }
 0xa64   :  { %v1766_v6 = vrot.slane %v1764_v11, 1  ;;  %v1767_v26 = vrot.slane %v1764_v11, 2  ;;  %v1768_v22 = vrot.slane %v1764_v11, 3  ;;  %v1769_v14 = vrot.slane %v1764_v11, 4 }
 0xa65   :  { %v1770_v5 = vrot.slane %v1764_v11, 5  ;;  %v1771_v15 = vrot.slane %v1764_v11, 6  ;;  %v1772_v16 = vrot.slane %v1764_v11, 7  ;;  %v1781_v39 = vsub.f32 %v1730_v62, %v1764_v11 }
 0xa66   :  { %v1782_v23 = vsub.f32 %v1731_v58, %v1766_v6  ;;  %v1783_v27 = vsub.f32 %v1732_v59, %v1767_v26  ;;  %v1784_v2 = vsub.f32 %v1733_v49, %v1768_v22  ;;  %v1785_v30 = vsub.f32 %v1734_v29, %v1769_v14  ;;  %v3061_v49 = vld [vmem:[%s4020_s12] sm:$0xff]   ;;  %v3062_v29 = vld [vmem:[%s4020_s12 + $0x8] sm:$0xff]  }
 0xa67   :  { %v1786_v12 = vsub.f32 %v1735_v42, %v1770_v5  ;;  %v1787_v9 = vsub.f32 %v1736_v45, %v1771_v15  ;;  %v1788_v19 = vsub.f32 %v1737_v3, %v1772_v16  ;;  %v1789_v28 = vmul.f32 %v1781_v39, %v1781_v39  ;;  %2952 = vmatpush3.bf16.msra.mxu1 %v3061_v49 }
 0xa68   :  { %v1790_v36 = vmul.f32 %v1782_v23, %v1782_v23  ;;  %v1791_v20 = vmul.f32 %v1783_v27, %v1783_v27  ;;  %v1792_v43 = vmul.f32 %v1784_v2, %v1784_v2  ;;  %v1793_v44 = vmul.f32 %v1785_v30, %v1785_v30  ;;  %2953 = vmatprep.subr.bf16.mxu1 %v3196_v61 }
 0xa69   :  { %v1794_v46 = vmul.f32 %v1786_v12, %v1786_v12  ;;  %v1795_v51 = vmul.f32 %v1787_v9, %v1787_v9  ;;  %v1796_v38 = vmul.f32 %v1788_v19, %v1788_v19  ;;  %v1853_v3 = vrot.slane %v72_v7, %v3394_v13 }
 0xa6a   :  { %v1805_v47 = vrot.slane %v1790_v36, 7  ;;  %v1807_v21 = vrot.slane %v1791_v20, 6  ;;  %v1809_v53 = vrot.slane %v1792_v43, 5  ;;  %v1811_v31 = vrot.slane %v1793_v44, 4 }
 0xa6b   :  { %v1813_v50 = vrot.slane %v1794_v46, 3  ;;  %v1815_v41 = vrot.slane %v1795_v51, 2  ;;  %v1817_v33 = vrot.slane %v1796_v38, 1  ;;  %2954 = vmatpush3.bf16.msra.mxu1 %v3062_v29 }
 0xa6c   :  { %v1806_v24 = vsel %vm1545_vm4, %v1805_v47, %v1789_v28  ;;  %2959 = vmatprep.subr.bf16.mxu1 %v3196_v61 }
 0xa6d   :  { %v1808_v17 = vsel %vm1548_vm5, %v1807_v21, %v1806_v24 }
 0xa6e   :  { %v1810_v37 = vsel %vm1551_vm6, %v1809_v53, %v1808_v17 }
 0xa6f   :  { %v1812_v34 = vsel %vm1554_vm7, %v1811_v31, %v1810_v37 }
 0xa70   :  { %v1814_v55 = vsel %vm1557_vm8, %v1813_v50, %v1812_v34 }
 0xa71   :  { %v1816_v57 = vsel %vm1560_vm9, %v1815_v41, %v1814_v55 }
 0xa72   :  { %v1818_v58 = vsel %vm1563_vm10, %v1817_v33, %v1816_v57 }
 0xa73   :  { %v1820_v59 = vsel %vm81_vm0, %v1818_v58, 0.0 }
 0xa74   :  { %1821 = vadd.xlane.f32.xlu1 %v1820_v59 }
 0xb01   :  { %v1822_v62 = vpop.xlane.xlu1 %1821 }
 0xb02   :  { %v1823_v42 = vmul.f32 0.03125, %v1822_v62 }
 0xb04   :  { %v1824_v0 = vadd.f32 1e-12, %v1823_v42 }
 0xb06   :  { %3136 = vrsqrt.f32 %v1824_v0 }
 0xb10   :  { %v3137_v45 = vpop.eup %3136 }
 0xb11   :  { %v1827_v10 = vrot.slane %v3137_v45, 1  ;;  %v1828_v32 = vrot.slane %v3137_v45, 2  ;;  %v1829_v18 = vrot.slane %v3137_v45, 3  ;;  %v1830_v35 = vrot.slane %v3137_v45, 4 }
 0xb12   :  { %v1831_v4 = vrot.slane %v3137_v45, 5  ;;  %v1832_v54 = vrot.slane %v3137_v45, 6  ;;  %v1833_v8 = vrot.slane %v3137_v45, 7  ;;  %v1842_v52 = vmul.f32 %v3137_v45, %v1781_v39 }
 0xb13   :  { %v1843_v63 = vmul.f32 %v1827_v10, %v1782_v23  ;;  %v1844_v48 = vmul.f32 %v1828_v32, %v1783_v27  ;;  %v1845_v40 = vmul.f32 %v1829_v18, %v1784_v2  ;;  %v1846_v1 = vmul.f32 %v1830_v35, %v1785_v30  ;;  %v3064_v10 = vld [vmem:[%s4022_s14] sm:$0xff]   ;;  %v3882_v32 = vld [vmem:[%s4023_s15 + $0x8] sm:$0xff]  }
 0xb14   :  { %v1847_v60 = vmul.f32 %v1831_v4, %v1786_v12  ;;  %v1848_v11 = vmul.f32 %v1832_v54, %v1787_v9  ;;  %v1849_v6 = vmul.f32 %v1833_v8, %v1788_v19  ;;  %v1854_v26 = vmul.f32 %v1853_v3, %v1842_v52  ;;  %2968 = vmatpush3.bf16.msra.mxu0 %v3064_v10  ;;  %v3066_v18 = vld [vmem:[%s4022_s14 + $0x8] sm:$0xff]   ;;  %v2700_v4 = vld [vmem:[%s4021_s13] ss:$0 sm:$0xff] }
 0xb15   :  { %v1855_v22 = vmul.f32 %v1853_v3, %v1843_v63  ;;  %v1856_v13 = vmul.f32 %v1853_v3, %v1844_v48  ;;  %v1857_v14 = vmul.f32 %v1853_v3, %v1845_v40  ;;  %v1858_v25 = vmul.f32 %v1853_v3, %v1846_v1  ;;  %2969 = vmatprep.subr.bf16.mxu0 %v3196_v61 }
 0xb16   :  { %v1859_v5 = vmul.f32 %v1853_v3, %v1847_v60  ;;  %v1860_v15 = vmul.f32 %v1853_v3, %v1848_v11  ;;  %v1861_v16 = vmul.f32 %v1853_v3, %v1849_v6  ;;  %v1866_v36 = vadd.f32 %v1865_v56, %v1854_v26 }
 0xb17   :  { %v1867_v20 = vadd.f32 %v1865_v56, %v1855_v22  ;;  %v1868_v43 = vadd.f32 %v1865_v56, %v1856_v13  ;;  %v1869_v44 = vadd.f32 %v1865_v56, %v1857_v14  ;;  %v1870_v39 = vadd.f32 %v1865_v56, %v1858_v25  ;;  %v3921_v25 = vld [vmem:[%s4024_s16] ss:$0 sm:$0xff]  ;;  %s3201_s16 = smov 32  }
 0xb18   :  { %v1871_v23 = vadd.f32 %v1865_v56, %v1859_v5  ;;  %v1872_v27 = vadd.f32 %v1865_v56, %v1860_v15  ;;  %v1873_v2 = vadd.f32 %v1865_v56, %v1861_v16  ;;  %v1874_v30 = vpack.c.bf16 %v1866_v36, %v1866_v36  ;;  %v3872_v56 = vld [vmem:[%s4023_s15] sm:$0xff]   ;;  %2970 = vmatpush3.bf16.msra.mxu0 %v3066_v18 }
 0xb19   :  { %v1875_v12 = vpack.c.bf16 %v1867_v20, %v1867_v20  ;;  %v1876_v9 = vpack.c.bf16 %v1868_v43, %v1868_v43  ;;  %v1877_v19 = vpack.c.bf16 %v1869_v44, %v1869_v44  ;;  %v1878_v28 = vpack.c.bf16 %v1870_v39, %v1870_v39  ;;  %2983 = vmatprep.subr.bf16.mxu0 %v3196_v61 }
 0xb1a   :  { %v1879_v46 = vpack.c.bf16 %v1871_v23, %v1871_v23  ;;  %v1880_v47 = vpack.c.bf16 %v1872_v27, %v1872_v27  ;;  %v1881_v21 = vpack.c.bf16 %v1873_v2, %v1873_v2  ;;  %v1901_v17 = vunpack.c.l.b16 %v1874_v30 }
 0xb1b   :  { %v1902_v51 = vunpack.c.l.b16 %v1875_v12  ;;  %v1903_v38 = vunpack.c.l.b16 %v1876_v9  ;;  %v1904_v24 = vunpack.c.l.b16 %v1877_v19  ;;  %v1905_v53 = vunpack.c.l.b16 %v1878_v28 }
 0xb1c   :  { %v1906_v31 = vunpack.c.l.b16 %v1879_v46  ;;  %v1907_v34 = vunpack.c.l.b16 %v1880_v47  ;;  %v1908_v41 = vunpack.c.l.b16 %v1881_v21  ;;  %v3200_v35 = vmov 0  }
 0xb1d   :  { %v1909_v37 = vrot.slane %v1902_v51, 7  ;;  %v1911_v50 = vrot.slane %v1903_v38, 6  ;;  %v1913_v33 = vrot.slane %v1904_v24, 5  ;;  %v1915_v58 = vrot.slane %v1905_v53, 4  ;;  %3047 = vset.pattern.permute.xlu0 %v3200_v35 }
 0xb1e   :  { %v1917_v49 = vrot.slane %v1906_v31, 3  ;;  %v1919_v62 = vrot.slane %v1907_v34, 2  ;;  %v1921_v0 = vrot.slane %v1908_v41, 1 }
 0xb1f   :  { %v1910_v55 = vsel %vm1545_vm4, %v1909_v37, %v1901_v17 }
 0xb20   :  { %v1912_v57 = vsel %vm1548_vm5, %v1911_v50, %v1910_v55 }
 0xb21   :  { %v1914_v59 = vsel %vm1551_vm6, %v1913_v33, %v1912_v57 }
 0xb22   :  { %v1916_v29 = vsel %vm1554_vm7, %v1915_v58, %v1914_v59 }
 0xb23   :  { %v1918_v42 = vsel %vm1557_vm8, %v1917_v49, %v1916_v29 }
 0xb24   :  { %v1920_v7 = vsel %vm1560_vm9, %v1919_v62, %v1918_v42 }
 0xb25   :  { %v1922_v45 = vsel %vm1563_vm10, %v1921_v0, %v1920_v7 }
 0xb26   :  { %v1923_v3 = vpack.c.b16 %v1922_v45, %v1922_v45 }
 0xb28   :  { %2956 = vmatmul.mubr.msk.bf16.vlgmr.msra.gmra.mrb[40].mxu1 %vm81_vm0, %v1923_v3 }
 0xb29   :  { %2963 = vmatprep.mubr.msk.bf16.mxu1 %vm3197_vm1, %v3196_v61  ;;  %2960 = vmatpush3.bf16.msra.mxu1 %v3872_v56 }
 0xb2a   :  { %2961 = vmatprep.subr.bf16.mxu1 %v3196_v61 }
 0xb2d   :  { %2962 = vmatpush3.bf16.msra.mxu1 %v3882_v32 }
 0xb2e   :  { %2975 = vmatprep.subr.bf16.mxu1 %v3196_v61 }
 0xb30   :  { %2964 = vmatmul.mubr.bf16.vlgmr.msra.gmra.mrb[44].mxu1 %v3200_v35 }
 0xb31   :  { %2976 = vmatpush3.bf16.msra.mxu1 %v3872_v56  ;;  %2979 = vmatprep.mubr.msk.bf16.mxu1 %vm3197_vm1, %v3196_v61 }
 0xb32   :  { %2977 = vmatprep.subr.bf16.mxu1 %v3196_v61 }
 0xb35   :  { %2978 = vmatpush3.bf16.msra.mxu1 %v3882_v32 }
 0xb36   :  { %2991 = vmatprep.subr.bf16.mxu1 %v3196_v61 }
 0xbfb   :  { %v1973_v54 = vpop.f32.mrb[40].mxu1 }
 0xbfc   :  { %v1974_v8 = vadd.f32 %v2700_v4, %v1973_v54  ;;  %v2957_v52 = vpop.f32.mrb[41].mxu1 }
 0xbfd   :  { %v1976_v63 = vpop.f32.mrb[42].mxu1 }
 0xbfe   :  { %3138 = vtanh.f32 %v1974_v8  ;;  %v2958_v48 = vpop.f32.mrb[43].mxu1 }
 0xc03   :  { %v2040_v26 = vpop.f32.mrb[44].mxu1 }
 0xc04   :  { %v2965_v22 = vpop.f32.mrb[45].mxu1 }
 0xc05   :  { %v2043_v13 = vpop.f32.mrb[46].mxu1 }
 0xc06   :  { %v2966_v14 = vpop.f32.mrb[47].mxu1 }
 0xc08   :  { %v3139_v40 = vpop.eup %3138 }
 0xc09   :  { %v1990_v1 = vpack.c.bf16 %v3139_v40, %v3139_v40 }
 0xc0b   :  { %2972 = vmatmul.mubr.msk.bf16.vlgmr.msra.gmra.mrb[48].mxu0 %vm81_vm0, %v1990_v1  ;;  %v2187_v60 = vrot.slane %v1990_v1, 1  ;;  %v2309_v11 = vrot.slane %v1990_v1, 2  ;;  %v2431_v6 = vrot.slane %v1990_v1, 3 }
 0xc0c   :  { %2984 = vmatpush3.bf16.msra.mxu0 %v3064_v10  ;;  %2987 = vmatprep.mubr.msk.bf16.mxu0 %vm3197_vm1, %v3196_v61 }
 0xc0d   :  { %2985 = vmatprep.subr.bf16.mxu0 %v3196_v61 }
 0xc10   :  { %2986 = vmatpush3.bf16.msra.mxu0 %v3066_v18 }
 0xc11   :  { %2999 = vmatprep.subr.bf16.mxu0 %v3196_v61 }
 0xc13   :  { %2988 = vmatmul.mubr.msk.bf16.vlgmr.msra.gmra.mrb[52].mxu0 %vm81_vm0, %v2187_v60 }
 0xc14   :  { %3000 = vmatpush3.bf16.msra.mxu0 %v3064_v10  ;;  %3003 = vmatprep.mubr.msk.bf16.mxu0 %vm3197_vm1, %v3196_v61 }
 0xc15   :  { %3001 = vmatprep.subr.bf16.mxu0 %v3196_v61 }
 0xc18   :  { %3002 = vmatpush3.bf16.msra.mxu0 %v3066_v18 }
 0xc19   :  { %3015 = vmatprep.subr.bf16.mxu0 %v3196_v61 }
 0xc1b   :  { %3004 = vmatmul.mubr.msk.bf16.vlgmr.msra.gmra.mrb[56].mxu0 %vm81_vm0, %v2309_v11 }
 0xc1c   :  { %3016 = vmatpush3.bf16.msra.mxu0 %v3064_v10  ;;  %3019 = vmatprep.mubr.msk.bf16.mxu0 %vm3197_vm1, %v3196_v61 }
 0xc1d   :  { %3017 = vmatprep.subr.bf16.mxu0 %v3196_v61 }
 0xc20   :  { %3018 = vmatpush3.bf16.msra.mxu0 %v3066_v18 }
 0xc21   :  { %3031 = vmatprep.subr.bf16.mxu0 %v3196_v61 }
 0xc23   :  { %3020 = vmatmul.mubr.msk.bf16.vlgmr.msra.gmra.mrb[60].mxu0 %vm81_vm0, %v2431_v6 }
 0xc24   :  { %3033 = vmatprep.mubr.msk.bf16.mxu0 %vm3197_vm1, %v3196_v61 }
 0xcde   :  { %v2095_v5 = vpop.f32.mrb[48].mxu0 }
 0xcdf   :  { %v2096_v15 = vadd.f32 %v2095_v5, %v2040_v26  ;;  %v2973_v16 = vpop.f32.mrb[49].mxu0 }
 0xce0   :  { %v2098_v36 = vpop.f32.mrb[50].mxu0 }
 0xce1   :  { %v2107_v20 = vadd.f32 %v3921_v25, %v2096_v15  ;;  %v2974_v43 = vpop.f32.mrb[51].mxu0 }
 0xce3   :  { %3140 = vtanh.f32 %v2107_v20  ;;  %v2710_v51 = vmul.f32 -1.442695, %v2107_v20 }
 0xce5   :  { %3142 = vpow2.f32 %v2710_v51 }
 0xce6   :  { %v2225_v44 = vpop.f32.mrb[52].mxu0 }
 0xce7   :  { %v2989_v39 = vpop.f32.mrb[53].mxu0 }
 0xce8   :  { %v2228_v23 = vpop.f32.mrb[54].mxu0 }
 0xce9   :  { %v2990_v27 = vpop.f32.mrb[55].mxu0 }
 0xced   :  { %v3141_v2 = vpop.eup %3140 }
 0xcee   :  { %v3924_v30 = vpop.f32.mrb[56].mxu0  ;;  %2117 = vrot.lane.b32.xlu0 %v3141_v2, %s3199_s22 }
 0xcef   :  { %v3005_v12 = vpop.f32.mrb[57].mxu0  ;;  %v3143_v38 = vpop.eup %3142 }
 0xcf0   :  { %v2350_v9 = vpop.f32.mrb[58].mxu0  ;;  %v2111_v24 = vadd.f32 1.0, %v3143_v38  ;;  %v3202_v38 = vmov 1  }
 0xcf1   :  { %v3006_v19 = vpop.f32.mrb[59].mxu0  ;;  %3048 = vset.pattern.permute.xlu1 %v3202_v38 }
 0xcf2   :  { %3144 = vrcp.f32 %v2111_v24 }
 0xcf6   :  { %v3927_v28 = vpop.f32.mrb[60].mxu0 }
 0xcf7   :  { %v3021_v46 = vpop.f32.mrb[61].mxu0 }
 0xcf8   :  { %v2472_v47 = vpop.f32.mrb[62].mxu0 }
 0xcf9   :  { %v3022_v21 = vpop.f32.mrb[63].mxu0 }
 0xcfc   :  { %v3145_v53 = vpop.eup %3144 }
 0xcfd   :  { %v2115_v37 = vmul.f32 0.0, %v3145_v53 }
 0xd60   :  { %v2118_v17 = vpop.permute.xlu0 %2117 }
 0xd61   :  { %v2120_v31 = vmul.f32 %v3145_v53, %v2118_v17 }
 0xd63   :  { %2122 = vrot.lane.b32.xlu1 %v2120_v31, %s3201_s16 }
 0xdd5   :  { %v2123_v50 = vpop.permute.xlu1 %2122 }
 0xdd6   :  { %v2125_v34 = vadd.f32 %v2123_v50, %v2115_v37  ;;  %v3203_v37 = vmov 3  }
 0xdd8   :  { %3146 = vtanh.f32 %v2125_v34 }
 0xde2   :  { %v3147_v41 = vpop.eup %3146 }
 0xde3   :  { %2128 = vrot.lane.b32.xlu1 %v3147_v41, %s3199_s22  ;;  %v3204_v41 = vmov 2  }
 0xe55   :  { %v2129_v55 = vpop.permute.xlu1 %2128 }
 0xe56   :  { %v3931_v33 = vmul.f32 %v3145_v53, %v2129_v55  ;;  %v1989_v53 = vld [vmem:[%s4045_s29] sm:$0x3] }
 0xe58   :  { %v2139_v57 = vpack.c.bf16 %v3931_v33, %v3931_v33 }
 0xe5a   :  { %2141 = vrot.lane.b32.xlu1 %v2139_v57, %s3201_s16 }
 0xecc   :  { %v2142_v58 = vpop.permute.xlu1 %2141 }
 0xecd   :  { %2980 = vmatmul.mubr.msk.bf16.vlgmr.msra.gmra.mrb[48].mxu1 %vm81_vm0, %v2142_v58 }
 0xece   :  { %2992 = vmatpush3.bf16.msra.mxu1 %v3872_v56  ;;  %2995 = vmatprep.mubr.msk.bf16.mxu1 %vm3197_vm1, %v3196_v61 }
 0xecf   :  { %2993 = vmatprep.subr.bf16.mxu1 %v3196_v61 }
 0xed2   :  { %2994 = vmatpush3.bf16.msra.mxu1 %v3882_v32 }
 0xed3   :  { %3007 = vmatprep.subr.bf16.mxu1 %v3196_v61 }
 0xfa0   :  { %v2180_v59 = vpop.f32.mrb[48].mxu1 }
 0xfa1   :  { %v2226_v49 = vadd.f32 %v2225_v44, %v2180_v59  ;;  %v2981_v29 = vpop.f32.mrb[49].mxu1  ;;  %v3067_v59 = vld [vmem:[%s4025_s17] sm:$0xff]  }
 0xfa2   :  { %v2183_v62 = vpop.f32.mrb[50].mxu1 }
 0xfa3   :  { %v2231_v42 = vadd.f32 %v3921_v25, %v2226_v49  ;;  %v2982_v0 = vpop.f32.mrb[51].mxu1  ;;  %v3068_v49 = vld [vmem:[%s4025_s17 + $0x8] sm:$0xff]  }
 0xfa5   :  { %3148 = vtanh.f32 %v2231_v42  ;;  %v2713_v45 = vmul.f32 -1.442695, %v2231_v42 }
 0xfa7   :  { %3150 = vpow2.f32 %v2713_v45 }
 0xfaf   :  { %v3149_v7 = vpop.eup %3148 }
 0xfb0   :  { %2241 = vrot.lane.b32.xlu0 %v3149_v7, %s3199_s22 }
 0xfb1   :  { %v3151_v3 = vpop.eup %3150 }
 0xfb2   :  { %v2235_v10 = vadd.f32 1.0, %v3151_v3 }
 0xfb4   :  { %3152 = vrcp.f32 %v2235_v10 }
 0xfbe   :  { %v3153_v18 = vpop.eup %3152 }
 0xfbf   :  { %v2239_v54 = vmul.f32 %v3153_v18, %v2125_v34 }
0x1022   :  { %v2242_v35 = vpop.permute.xlu0 %2241 }
0x1023   :  { %v2244_v4 = vmul.f32 %v3153_v18, %v2242_v35 }
0x1025   :  { %2246 = vrot.lane.b32.xlu1 %v2244_v4, %s3201_s16 }
0x1097   :  { %v2247_v8 = vpop.permute.xlu1 %2246 }
0x1098   :  { %v2249_v52 = vadd.f32 %v2247_v8, %v2239_v54 }
0x109a   :  { %3154 = vtanh.f32 %v2249_v52 }
0x10a4   :  { %v3155_v63 = vpop.eup %3154 }
0x10a5   :  { %2252 = vrot.lane.b32.xlu0 %v3155_v63, %s3199_s22 }
0x1117   :  { %v2253_v48 = vpop.permute.xlu0 %2252 }
0x1118   :  { %v3947_v40 = vmul.f32 %v3153_v18, %v2253_v48  ;;  %v3069_v48 = vld [vmem:[%s4027_s19] sm:$0xff]  }
0x1119   :  { %3032 = vmatpush3.bf16.msra.mxu0 %v3069_v48 }
0x111a   :  { %v2262_v1 = vpack.c.bf16 %v3947_v40, %v3947_v40 }
0x111c   :  { %2264 = vrot.lane.b32.xlu1 %v2262_v1, %s3201_s16 }
0x118e   :  { %v2265_v60 = vpop.permute.xlu1 %2264 }
0x118f   :  { %2996 = vmatmul.mubr.msk.bf16.vlgmr.msra.gmra.mrb[52].mxu1 %vm81_vm0, %v2265_v60 }
0x1190   :  { %3008 = vmatpush3.bf16.msra.mxu1 %v3872_v56  ;;  %3011 = vmatprep.mubr.msk.bf16.mxu1 %vm3197_vm1, %v3196_v61 }
0x1191   :  { %3009 = vmatprep.subr.bf16.mxu1 %v3196_v61 }
0x1194   :  { %3010 = vmatpush3.bf16.msra.mxu1 %v3882_v32 }
0x1195   :  { %3023 = vmatprep.subr.bf16.mxu1 %v3196_v61 }
0x1262   :  { %v2303_v11 = vpop.f32.mrb[52].mxu1 }
0x1263   :  { %v2348_v6 = vadd.f32 %v3924_v30, %v2303_v11  ;;  %v2997_v26 = vpop.f32.mrb[53].mxu1 }
0x1264   :  { %v2306_v22 = vpop.f32.mrb[54].mxu1 }
0x1265   :  { %v2353_v13 = vadd.f32 %v3921_v25, %v2348_v6  ;;  %v2998_v14 = vpop.f32.mrb[55].mxu1  ;;  %v2724_v22 = vld [vmem:[%s4028_s20] ss:$0 sm:$0xff] }
0x1267   :  { %3156 = vtanh.f32 %v2353_v13  ;;  %v2716_v56 = vmul.f32 -1.442695, %v2353_v13 }
0x1269   :  { %3158 = vpow2.f32 %v2716_v56 }
0x1271   :  { %v3157_v5 = vpop.eup %3156 }
0x1272   :  { %2363 = vrot.lane.b32.xlu0 %v3157_v5, %s3199_s22 }
0x1273   :  { %v3159_v15 = vpop.eup %3158 }
0x1274   :  { %v2357_v16 = vadd.f32 1.0, %v3159_v15 }
0x1276   :  { %3160 = vrcp.f32 %v2357_v16 }
0x1280   :  { %v3161_v32 = vpop.eup %3160 }
0x1281   :  { %v2361_v43 = vmul.f32 %v3161_v32, %v2249_v52 }
0x12e4   :  { %v2364_v36 = vpop.permute.xlu0 %2363 }
0x12e5   :  { %v2366_v20 = vmul.f32 %v3161_v32, %v2364_v36 }
0x12e7   :  { %2368 = vrot.lane.b32.xlu1 %v2366_v20, %s3201_s16 }
0x1359   :  { %v2369_v44 = vpop.permute.xlu1 %2368 }
0x135a   :  { %v2371_v39 = vadd.f32 %v2369_v44, %v2361_v43 }
0x135c   :  { %3162 = vtanh.f32 %v2371_v39 }
0x1366   :  { %v3163_v23 = vpop.eup %3162 }
0x1367   :  { %2374 = vrot.lane.b32.xlu0 %v3163_v23, %s3199_s22 }
0x13d9   :  { %v2375_v27 = vpop.permute.xlu0 %2374 }
0x13da   :  { %v2377_v2 = vmul.f32 %v3161_v32, %v2375_v27 }
0x13dc   :  { %v2384_v30 = vpack.c.bf16 %v2377_v2, %v2377_v2 }
0x13de   :  { %2386 = vrot.lane.b32.xlu1 %v2384_v30, %s3201_s16 }
0x1450   :  { %v2387_v12 = vpop.permute.xlu1 %2386 }
0x1451   :  { %3012 = vmatmul.mubr.msk.bf16.vlgmr.msra.gmra.mrb[56].mxu1 %vm81_vm0, %v2387_v12 }
0x1452   :  { %3027 = vmatprep.mubr.msk.bf16.mxu1 %vm3197_vm1, %v3196_v61  ;;  %3024 = vmatpush3.bf16.msra.mxu1 %v3067_v59 }
0x1453   :  { %3025 = vmatprep.subr.bf16.mxu1 %v3196_v61 }
0x1456   :  { %3026 = vmatpush3.bf16.msra.mxu1 %v3068_v49 }
0x1524   :  { %v2425_v9 = vpop.f32.mrb[56].mxu1 }
0x1525   :  { %v2470_v19 = vadd.f32 %v3927_v28, %v2425_v9  ;;  %v3013_v46 = vpop.f32.mrb[57].mxu1 }
0x1526   :  { %v2428_v47 = vpop.f32.mrb[58].mxu1 }
0x1527   :  { %v2475_v21 = vadd.f32 %v3921_v25, %v2470_v19  ;;  %v3014_v51 = vpop.f32.mrb[59].mxu1 }
0x1529   :  { %3164 = vtanh.f32 %v2475_v21  ;;  %v2719_v17 = vmul.f32 -1.442695, %v2475_v21 }
0x152b   :  { %3166 = vpow2.f32 %v2719_v17 }
0x1533   :  { %v3165_v24 = vpop.eup %3164 }
0x1534   :  { %2485 = vrot.lane.b32.xlu0 %v3165_v24, %s3199_s22 }
0x1535   :  { %v3167_v31 = vpop.eup %3166 }
0x1536   :  { %v2479_v28 = vadd.f32 1.0, %v3167_v31 }
0x1538   :  { %2134 = vperm.xlu0 %3047, %v1989_v53   ;;  %3168 = vrcp.f32 %v2479_v28 }
0x153c   :  { %3050 = vset.pattern.permute.xlu0 %v3203_v37 }
0x153d   :  { %2501 = vperm.xlu0 %3050, %v1989_v53  }
0x1542   :  { %v3169_v25 = vpop.eup %3168 }
0x1543   :  { %v2483_v55 = vmul.f32 %v3169_v25, %v2371_v39 }
0x15a6   :  { %v2486_v50 = vpop.permute.xlu0 %2485 }
0x15a7   :  { %v2488_v34 = vmul.f32 %v3169_v25, %v2486_v50 }
0x15a9   :  { %2490 = vrot.lane.b32.xlu1 %v2488_v34, %s3201_s16 }
0x15ad   :  { %2257 = vperm.xlu1 %3048, %v1989_v53  }
0x15b1   :  { %3049 = vset.pattern.permute.xlu1 %v3204_v41 }
0x15b2   :  { %2379 = vperm.xlu1 %3049, %v1989_v53  }
0x15b7   :  { %v2135_v42 = vpop.permute.xlu0 %2134 }
0x15b8   :  { %v2137_v45 = vmul.f32 %v2135_v42, %v3931_v33  ;;  %v2720_v33 = vld [vmem:[%s4026_s18] ss:$0 sm:$0xff]  ;;  %s3172_s18 = scalar_lea.vmem %s2645_s7, 32 }
0x15b9   :  { %p3173_p0 = scmp.ne.s32.totalorder %s2645_s7, %s3172_s18  ;;  %p3178_p2 = scmp.lt.s32.totalorder %s3172_s18, %s3172_s18 }
0x15bb   :  { %p3179_p3 = por %p3178_p2, %p3177_p1 }
0x15bc   :  { %v2502_v18 = vpop.permute.xlu0 %2501 }
0x15bd   :  { %p3180_p4 = pnand %p3179_p3, %p3173_p0 }
0x161b   :  { %v2491_v57 = vpop.permute.xlu1 %2490 }
0x161c   :  { %v2493_v58 = vadd.f32 %v2491_v57, %v2483_v55 }
0x161e   :  { %3170 = vtanh.f32 %v2493_v58 }
0x1628   :  { %v3171_v29 = vpop.eup %3170 }
0x1629   :  { %2496 = vrot.lane.b32.xlu1 %v3171_v29, %s3199_s22 }
0x162c   :  { %v2258_v62 = vpop.permute.xlu1 %2257 }
0x162d   :  { %v2260_v7 = vmul.f32 %v2258_v62, %v3947_v40 }
0x162f   :  { %v2261_v35 = vadd.f32 %v2260_v7, %v2137_v45 }
0x1631   :  { %v2380_v0 = vpop.permute.xlu1 %2379 }
0x1632   :  { %v2382_v3 = vmul.f32 %v2380_v0, %v2377_v2 }
0x1634   :  { %v2383_v54 = vadd.f32 %v2382_v3, %v2261_v35 }
0x169b   :  { %v2497_v10 = vpop.permute.xlu1 %2496 }
0x169c   :  { %v2499_v4 = vmul.f32 %v3169_v25, %v2497_v10 }
0x169e   :  { %v2504_v8 = vmul.f32 %v2502_v18, %v2499_v4 }
0x16a0   :  { %v2505_v52 = vadd.f32 %v2504_v8, %v2383_v54 }
0x16a2   :  { %v2506_v61 = vpack.c.bf16 %v2505_v52, %v2505_v52 }
0x16a4   :  { %2519 = vrot.lane.b32.xlu1 %v2506_v61, %s3201_s16 }
0x1716   :  { %v2520_v63 = vpop.permute.xlu1 %2519 }
0x1717   :  { %3028 = vmatmul.mubr.msk.bf16.vlgmr.msra.gmra.mrb[60].mxu1 %vm81_vm0, %v2520_v63 }
0x17ea   :  { %v2570_v40 = vpop.f32.mrb[60].mxu1 }
0x17eb   :  { %v2571_v1 = vadd.f32 %v2720_v33, %v2570_v40  ;;  %v3029_v60 = vpop.f32.mrb[61].mxu1 }
0x17ec   :  { %v2573_v11 = vpop.f32.mrb[62].mxu1 }
0x17ed   :  { %v2576_v6 = vpack.c.bf16 %v2571_v1, %v2571_v1  ;;  %v3030_v26 = vpop.f32.mrb[63].mxu1 }
0x17ef   :  { %3034 = vmatmul.mubr.msk.bf16.vlgmr.msra.gmra.mrb[64].mxu0 %vm2592_vm12, %v2576_v6 }
0x18c2   :  { %v2630_v13 = vpop.f32.mrb[64].mxu0 }
0x18c3   :  { %v2631_v14 = vadd.f32 %v2724_v22, %v2630_v13  ;;  %v3035_v5 = vpop.f32.mrb[65].mxu0 }
0x18c4   :  { %v2633_v56 = vpop.f32.mrb[66].mxu0 }
0x18c5   :  { %v3036_v15 = vpop.f32.mrb[67].mxu0  ;;  %2637 = vst.msk [vmem:[#allocation2] sm:$0x3] %vm2636_vm13, %v2631_v14 }
0x18c6   :  { %3183 = shalt.err (!%p3180_p4)
}
0x18c7   :  { %s3184_s20 = scalar_lea.hbm %s4029_s21, 32 }
0x18c8   :  { %p3185_p5 = scmp.ne.s32.totalorder %s4029_s21, %s3184_s20  ;;  %p3188_p6 = scmp.lt.u32.totalorder %s3184_s20, %s4029_s21 }
0x18ca   :  { %p3190_p7 = pnand %p3188_p6, %p3185_p5 }
0x18cc   :  { %3193 = shalt.err (!%p3190_p7)
}
0x18cd   :  { %2647 = dma.vmem_to_hbm [thread:$0]  %s2645_s7, 32, %s4029_s21, [#allocation3]  }
0x18ce   :  { %3194 = dma.done.wait [#allocation3], 32  }
0x18cf   :  { %3195 = vsyncadd [#allocation3], 4294967264 }
0x18d0   :  { %2651 = vsyncpa [#allocation3], 1 }

</bundles_post_ra>
